<compile_context>
chip_gen: v7x
topology: tpu7x:2x2x1
jax: 0.10.0
libtpu: 0.0.40
codegen_flags: <defaults>
</compile_context>

<pallas_src>
import functools

import jax
import jax.numpy as jnp
from jax.experimental import pallas as pl
from jax.experimental.pallas import tpu as pltpu

# Full-precision accumulation for f32 inputs (no-op for native bf16 MXU inputs).
PREC = jax.lax.Precision.HIGHEST


def cbam_kernel(x_ref, w1_ref, w2_ref, wsp_ref, mask_ref, o_ref, col_ref,
                *, H, W, K, C, Bt, G):
    # x_ref   : (Bt, C, HW)   input block (Bt batch elements)
    # w1_ref  : (C//r, C)     first 1x1 conv of the shared MLP (no bias)
    # w2_ref  : (C, C//r)     second 1x1 conv of the shared MLP (no bias)
    # wsp_ref : (1, K*G)      spatial conv weights, col kj*G + 2*ki + ch
    # mask_ref: (K*G, Bt*HW)  precomputed SAME-padding validity masks
    # o_ref   : (Bt, C, HW)   output block
    # col_ref : (K*G, Bt*HW)  VMEM im2col scratch
    HW = H * W
    N = Bt * HW
    P = (K - 1) // 2
    f32 = jnp.float32
    dt = x_ref.dtype

    # ---------------- Channel attention (batched, fused shared MLP) --------
    x_all = x_ref[...].reshape(Bt * C, HW)                        # input dtype
    inv_hw = jnp.full((1, HW), 1.0 / HW, dtype=dt)
    # avg pool on the MXU (f32 accumulation); max pool on the XLU.
    avg_all = jax.lax.dot_general(x_all, inv_hw, (((1,), (1,)), ((), ())),
                                  preferred_element_type=f32,
                                  precision=PREC)                 # (Bt*C, 1)
    max_all = jnp.max(x_all, axis=-1, keepdims=True).astype(f32)  # (Bt*C, 1)

    cols = [avg_all[b * C:(b + 1) * C, :] for b in range(Bt)]
    cols += [max_all[b * C:(b + 1) * C, :] for b in range(Bt)]
    stats = jnp.concatenate(cols, axis=1).astype(dt)              # (C, 2*Bt)

    h = jnp.maximum(
        jnp.dot(w1_ref[...], stats, preferred_element_type=f32,
                precision=PREC), 0.0)                             # (C//r, 2*Bt)
    y = jnp.dot(w2_ref[...], h.astype(dt), preferred_element_type=f32,
                precision=PREC)                                   # (C, 2*Bt)
    ca = jax.nn.sigmoid(y[:, :Bt] + y[:, Bt:])                    # (C, Bt) f32

    # ---------------- Spatial stats (mean via MXU, max via XLU) ------------
    inv_c = jnp.full((1, C), 1.0 / C, dtype=dt)
    avg_rows, max_rows = [], []
    for b in range(Bt):
        xb = x_ref[b]                                             # (C, HW)
        cab = ca[:, b:b + 1].astype(dt)                           # (C, 1)
        prod = xb * cab                                           # (C, HW) transient, input dtype
        avg_rows.append(jnp.dot(inv_c, prod, preferred_element_type=f32,
                                precision=PREC))                  # (1, HW)
        max_rows.append(jnp.max(prod, axis=0, keepdims=True).astype(f32))
    s2 = jnp.concatenate(
        [jnp.concatenate(avg_rows, axis=1),
         jnp.concatenate(max_rows, axis=1)], axis=0).astype(dt)   # (2, N)

    # ---------------- Spatial attention: factored rolls + masked im2col ----
    # Row block: rows 2*ki+ch = [avg,max] map rolled by -(ki-P)*W, zero-padded
    # to G rows so every scratch store below is an aligned full-tile slab.
    rb = []
    for ki in range(K):
        di = ki - P
        rb.append(s2 if di == 0
                  else pltpu.roll(s2, shift=(-di * W) % N, axis=1))
    if G > 2 * K:
        rb.append(jnp.zeros((G - 2 * K, N), dtype=dt))
    rowblock = jnp.concatenate(rb, axis=0)                        # (G, N)

    for kj in range(K):
        dj = kj - P
        sh = rowblock if dj == 0 \
            else pltpu.roll(rowblock, shift=(-dj) % N, axis=1)
        col_ref[pl.ds(kj * G, G), :] = sh * mask_ref[pl.ds(kj * G, G), :]

    conv = jnp.dot(wsp_ref[...], col_ref[...], preferred_element_type=f32,
                   precision=PREC)                                # (1, N)
    sa = jax.nn.sigmoid(conv)                                     # (1, N) f32

    # ---------------- Output: o = x * ca * sa (recompute, no stored out1) --
    for b in range(Bt):
        xb = x_ref[b]
        cab = ca[:, b:b + 1].astype(dt)
        sab = sa[:, b * HW:(b + 1) * HW].astype(dt)
        o_ref[b] = (xb * cab * sab).astype(o_ref.dtype)


def cbam_forward(x_nchw, w1, w2, w_sp):
    B, C, H, W = x_nchw.shape
    HW = H * W
    K = w_sp.shape[-1]
    Cr = w1.shape[0]
    P = (K - 1) // 2
    G = ((2 * K + 7) // 8) * 8        # per-kj group rows, padded to sublane tile

    assert HW % 128 == 0, "H*W must be a multiple of 128 (lane dim)"
    assert C % 8 == 0, "C must be a multiple of 8 (sublane dim)"

    dt = x_nchw.dtype
    itemsize = jnp.dtype(dt).itemsize
    x = x_nchw.reshape(B, C, HW)

    # ---- batch elements per grid step (VMEM-budgeted; keep >= 2 grid steps
    # so both v7x TensorCores get work) ----
    def _step_bytes(bt):
        blk = bt * C * HW * itemsize
        colb = K * G * bt * HW * itemsize
        wts = (Cr * C + C * Cr + K * G) * itemsize
        temps = (2 * C * HW + 8 * bt * HW + 8 * C) * 4
        return 4 * blk + 3 * colb + 2 * wts + temps

    budget = 24 << 20                 # conservative: fits v7x's 64 MiB VMEM
    Bt = 1
    for cand in range(1, B + 1):
        if B % cand:
            continue
        if B >= 2 and B // cand < 2:
            continue
        if _step_bytes(cand) <= budget:
            Bt = cand
    # TODO(synk): for shapes where even Bt=1 exceeds the budget (e.g. C=2048
    # at 56x56 on v7x) add an HW-tiled two-pass variant (pool pass + apply pass).

    grid = (B // Bt,)
    N = Bt * HW

    # ---- spatial conv weights flattened to the col layout ----
    # col row kj*G + 2*ki + ch  <->  w_sp[0, ch, ki, kj]; pad rows get weight 0.
    w_flat = jnp.transpose(w_sp[0].astype(jnp.float32), (2, 1, 0)).reshape(K, 2 * K)
    w_flat = jnp.pad(w_flat, ((0, 0), (0, G - 2 * K)))
    w_row = w_flat.reshape(1, K * G).astype(dt)

    # ---- precomputed SAME-padding validity masks (batch/grid invariant) ----
    lane = jnp.arange(HW, dtype=jnp.int32)
    cc = lane % W
    rr = lane // W
    mrows = []
    for kj in range(K):
        dj = kj - P
        col_ok = jnp.logical_and(cc + dj >= 0, cc + dj < W)
        for ki in range(K):
            di = ki - P
            row_ok = jnp.logical_and(rr + di >= 0, rr + di < H)
            m = jnp.logical_and(row_ok, col_ok).astype(dt)
            mrows.append(m)           # avg channel tap (ki, kj)
            mrows.append(m)           # max channel tap (ki, kj)
        for _ in range(G - 2 * K):
            mrows.append(jnp.zeros((HW,), dtype=dt))
    mask = jnp.stack(mrows, axis=0)                   # (K*G, HW)
    if Bt > 1:
        mask = jnp.tile(mask, (1, Bt))                # (K*G, N)

    vmem_limit = int(min(100 << 20, max(32 << 20, int(1.5 * _step_bytes(Bt)))))

    kernel = functools.partial(cbam_kernel, H=H, W=W, K=K, C=C, Bt=Bt, G=G)
    out = pl.pallas_call(
        kernel,
        out_shape=jax.ShapeDtypeStruct((B, C, HW), dt),
        grid_spec=pltpu.PrefetchScalarGridSpec(
            num_scalar_prefetch=0,
            grid=grid,
            in_specs=[
                pl.BlockSpec((Bt, C, HW), lambda i: (i, 0, 0)),
                pl.BlockSpec((Cr, C), lambda i: (0, 0)),
                pl.BlockSpec((C, Cr), lambda i: (0, 0)),
                pl.BlockSpec((1, K * G), lambda i: (0, 0)),
                pl.BlockSpec((K * G, N), lambda i: (0, 0)),
            ],
            out_specs=pl.BlockSpec((Bt, C, HW), lambda i: (i, 0, 0)),
            scratch_shapes=[pltpu.VMEM((K * G, N), dt)],
        ),
        compiler_params=pltpu.CompilerParams(
            dimension_semantics=("parallel",),
            vmem_limit_bytes=vmem_limit,
        ),
    )(x, w1.astype(dt), w2.astype(dt), w_row, mask)

    return out.reshape(B, C, H, W)


def cbam_reference(x, w1, w2, w_sp):
    """Pure-JAX reference mirroring the PyTorch CBAM forward (full f32)."""
    prec = jax.lax.Precision.HIGHEST
    # Channel attention
    avg = jnp.mean(x, axis=(2, 3))   # (B, C)
    mx = jnp.max(x, axis=(2, 3))     # (B, C)

    def fc(v):  # (B, C)
        h = jax.nn.relu(jnp.dot(v, w1.T, precision=prec))   # (B, C//r)
        return jnp.dot(h, w2.T, precision=prec)             # (B, C)

    ca = jax.nn.sigmoid(fc(avg) + fc(mx))[:, :, None, None]
    out1 = ca * x

    # Spatial attention
    s_avg = jnp.mean(out1, axis=1, keepdims=True)
    s_max = jnp.max(out1, axis=1, keepdims=True)
    s = jnp.concatenate([s_avg, s_max], axis=1)              # (B, 2, H, W)
    sa = jax.lax.conv_general_dilated(
        s, w_sp, window_strides=(1, 1), padding="SAME",
        dimension_numbers=("NCHW", "OIHW", "NCHW"), precision=prec)
    sa = jax.nn.sigmoid(sa)
    return sa * out1


if __name__ == "__main__":
    # in_planes=32, ratio=16 -> hidden=2; kernel_size=7
    B, C, H, W = 2, 32, 16, 16
    ratio, K = 16, 7
    Cr = C // ratio

    key = jax.random.PRNGKey(0)
    k_x, k_w1, k_w2, k_ws = jax.random.split(key, 4)

    x = jax.random.normal(k_x, (B, C, H, W), dtype=jnp.float32)
    # Deterministic synthetic parameters (shapes match the nn.Conv2d weights).
    w1 = 0.1 * jax.random.normal(k_w1, (Cr, C), dtype=jnp.float32)          # Conv2d(C, C//r, 1)
    w2 = 0.1 * jax.random.normal(k_w2, (C, Cr), dtype=jnp.float32)          # Conv2d(C//r, C, 1)
    w_sp = 0.05 * jax.random.normal(k_ws, (1, 2, K, K), dtype=jnp.float32)  # Conv2d(2, 1, 7)

    out = cbam_forward(x, w1, w2, w_sp)
    out = jax.block_until_ready(out)

    ref = cbam_reference(x, w1, w2, w_sp)
    assert out.shape == (B, C, H, W)
    err = jnp.max(jnp.abs(out - ref))
    assert err < 1e-3, f"mismatch vs reference: {err}"

    print("KERNEL_OK")
</pallas_src>

<mosaic_0001>
module attributes {stable_mosaic.version = 11 : i64} {
  func.func @cbam_kernel(%arg0: i32, %arg1: memref<1x32x256xf32, #tpu.memory_space<vmem>>, %arg2: memref<2x32xf32, #tpu.memory_space<vmem>>, %arg3: memref<32x2xf32, #tpu.memory_space<vmem>>, %arg4: memref<1x112xf32, #tpu.memory_space<vmem>>, %arg5: memref<112x256xf32, #tpu.memory_space<vmem>>, %arg6: memref<1x32x256xf32, #tpu.memory_space<vmem>>, %arg7: memref<112x256xf32, #tpu.memory_space<vmem>>) attributes {dimension_semantics = [#tpu.dimension_semantics<parallel>], iteration_bounds = array<i64: 2>, scalar_prefetch = 0 : i64, scratch_operands = 1 : i64, tpu.core_type = #tpu.core_type<tc>, window_params = [{transform_indices = @transform_0, window_bounds = array<i64: 1, 32, 256>}, {pipeline_mode = #tpu.pipeline_mode<synchronous>, transform_indices = @transform_1, window_bounds = array<i64: 2, 32>}, {pipeline_mode = #tpu.pipeline_mode<synchronous>, transform_indices = @transform_2, window_bounds = array<i64: 32, 2>}, {pipeline_mode = #tpu.pipeline_mode<synchronous>, transform_indices = @transform_3, window_bounds = array<i64: 1, 112>}, {pipeline_mode = #tpu.pipeline_mode<synchronous>, transform_indices = @transform_4, window_bounds = array<i64: 112, 256>}, {transform_indices = @transform_5, window_bounds = array<i64: 1, 32, 256>}]} {
    %c0 = arith.constant 0 : index
    %c0_0 = arith.constant 0 : index
    %c0_1 = arith.constant 0 : index
    %0 = vector.load %arg1[%c0, %c0_0, %c0_1] : memref<1x32x256xf32, #tpu.memory_space<vmem>>, vector<1x32x256xf32>
    %1 = vector.shape_cast %0 : vector<1x32x256xf32> to vector<32x256xf32>
    %cst = arith.constant 3.906250e-03 : f32
    %2 = vector.broadcast %cst : f32 to vector<1x256xf32>
    %cst_2 = arith.constant dense<0.000000e+00> : vector<32x1xf32>
    %3 = tpu.matmul %1, %2, %cst_2 {dimension_numbers = #tpu.dot_dimension_numbers<[1], [1], [0], [0], [0, 0, 1, 0], [], []>, precision = #tpu.contract_precision<fp32>} : vector<32x256xf32>, vector<1x256xf32>, vector<32x1xf32> -> vector<32x1xf32>
    %cst_3 = arith.constant dense<0xFF800000> : vector<32xf32>
    %4 = vector.multi_reduction <maximumf>, %1, %cst_3 [1] : vector<32x256xf32> to vector<32xf32>
    %5 = vector.shape_cast %4 : vector<32xf32> to vector<32x1xf32>
    %6 = tpu.concatenate %3, %5 in 1 : vector<32x1xf32>, vector<32x1xf32> -> vector<32x2xf32>
    %c0_4 = arith.constant 0 : index
    %c0_5 = arith.constant 0 : index
    %7 = vector.load %arg2[%c0_4, %c0_5] : memref<2x32xf32, #tpu.memory_space<vmem>>, vector<2x32xf32>
    %cst_6 = arith.constant dense<0.000000e+00> : vector<2x2xf32>
    %8 = tpu.matmul %7, %6, %cst_6 {dimension_numbers = #tpu.dot_dimension_numbers<[1], [0], [0], [1], [0, 0, 1, 1], [], []>, precision = #tpu.contract_precision<fp32>} : vector<2x32xf32>, vector<32x2xf32>, vector<2x2xf32> -> vector<2x2xf32>
    %cst_7 = arith.constant 0.000000e+00 : f32
    %9 = vector.broadcast %cst_7 : f32 to vector<2x2xf32>
    %10 = arith.maximumf %8, %9 : vector<2x2xf32>
    %c0_8 = arith.constant 0 : index
    %c0_9 = arith.constant 0 : index
    %11 = vector.load %arg3[%c0_8, %c0_9] : memref<32x2xf32, #tpu.memory_space<vmem>>, vector<32x2xf32>
    %cst_10 = arith.constant dense<0.000000e+00> : vector<32x2xf32>
    %12 = tpu.matmul %11, %10, %cst_10 {dimension_numbers = #tpu.dot_dimension_numbers<[1], [0], [0], [1], [0, 0, 1, 1], [], []>, precision = #tpu.contract_precision<fp32>} : vector<32x2xf32>, vector<2x2xf32>, vector<32x2xf32> -> vector<32x2xf32>
    %13 = vector.extract_strided_slice %12 {offsets = [0, 0], sizes = [32, 1], strides = [1, 1]} : vector<32x2xf32> to vector<32x1xf32>
    %14 = vector.extract_strided_slice %12 {offsets = [0, 1], sizes = [32, 1], strides = [1, 1]} : vector<32x2xf32> to vector<32x1xf32>
    %15 = arith.addf %13, %14 : vector<32x1xf32>
    %16 = arith.negf %15 : vector<32x1xf32>
    %17 = math.exp %16 : vector<32x1xf32>
    %cst_11 = arith.constant 1.000000e+00 : f32
    %18 = vector.broadcast %cst_11 : f32 to vector<32x1xf32>
    %19 = arith.addf %18, %17 : vector<32x1xf32>
    %20 = arith.divf %18, %19 : vector<32x1xf32>
    %cst_12 = arith.constant 3.125000e-02 : f32
    %21 = vector.broadcast %cst_12 : f32 to vector<1x32xf32>
    %c0_13 = arith.constant 0 : index
    %c0_14 = arith.constant 0 : index
    %c0_15 = arith.constant 0 : index
    %22 = vector.load %arg1[%c0_13, %c0_14, %c0_15] : memref<1x32x256xf32, #tpu.memory_space<vmem>>, vector<1x32x256xf32>
    %23 = vector.shape_cast %22 : vector<1x32x256xf32> to vector<32x256xf32>
    %24 = vector.broadcast %20 : vector<32x1xf32> to vector<32x256xf32>
    %25 = arith.mulf %23, %24 : vector<32x256xf32>
    %cst_16 = arith.constant dense<0.000000e+00> : vector<1x256xf32>
    %26 = tpu.matmul %21, %25, %cst_16 {dimension_numbers = #tpu.dot_dimension_numbers<[1], [0], [0], [1], [0, 0, 1, 1], [], []>, precision = #tpu.contract_precision<fp32>} : vector<1x32xf32>, vector<32x256xf32>, vector<1x256xf32> -> vector<1x256xf32>
    %cst_17 = arith.constant dense<0xFF800000> : vector<256xf32>
    %27 = vector.multi_reduction <maximumf>, %25, %cst_17 [0] : vector<32x256xf32> to vector<256xf32>
    %28 = vector.shape_cast %27 : vector<256xf32> to vector<1x256xf32>
    %29 = tpu.concatenate %26, %28 in 0 : vector<1x256xf32>, vector<1x256xf32> -> vector<2x256xf32>
    %c48_i32 = arith.constant 48 : i32
    %30 = tpu.dynamic_rotate %29 by %c48_i32 dim 1 : vector<2x256xf32>, i32 -> vector<2x256xf32>
    %c32_i32 = arith.constant 32 : i32
    %31 = tpu.dynamic_rotate %29 by %c32_i32 dim 1 : vector<2x256xf32>, i32 -> vector<2x256xf32>
    %c16_i32 = arith.constant 16 : i32
    %32 = tpu.dynamic_rotate %29 by %c16_i32 dim 1 : vector<2x256xf32>, i32 -> vector<2x256xf32>
    %c240_i32 = arith.constant 240 : i32
    %33 = tpu.dynamic_rotate %29 by %c240_i32 dim 1 : vector<2x256xf32>, i32 -> vector<2x256xf32>
    %c224_i32 = arith.constant 224 : i32
    %34 = tpu.dynamic_rotate %29 by %c224_i32 dim 1 : vector<2x256xf32>, i32 -> vector<2x256xf32>
    %c208_i32 = arith.constant 208 : i32
    %35 = tpu.dynamic_rotate %29 by %c208_i32 dim 1 : vector<2x256xf32>, i32 -> vector<2x256xf32>
    %cst_18 = arith.constant 0.000000e+00 : f32
    %36 = vector.broadcast %cst_18 : f32 to vector<2x256xf32>
    %37 = tpu.concatenate %30, %31, %32, %29, %33, %34, %35, %36 in 0 : vector<2x256xf32>, vector<2x256xf32>, vector<2x256xf32>, vector<2x256xf32>, vector<2x256xf32>, vector<2x256xf32>, vector<2x256xf32>, vector<2x256xf32> -> vector<16x256xf32>
    %c3_i32 = arith.constant 3 : i32
    %38 = tpu.dynamic_rotate %37 by %c3_i32 dim 1 : vector<16x256xf32>, i32 -> vector<16x256xf32>
    %c0_19 = arith.constant 0 : index
    %c0_20 = arith.constant 0 : index
    %39 = vector.load %arg5[%c0_19, %c0_20] : memref<112x256xf32, #tpu.memory_space<vmem>>, vector<16x256xf32>
    %40 = arith.mulf %38, %39 : vector<16x256xf32>
    %c0_21 = arith.constant 0 : index
    %c0_22 = arith.constant 0 : index
    %41 = vector.load %arg7[%c0_21, %c0_22] : memref<112x256xf32, #tpu.memory_space<vmem>>, vector<16x256xf32>
    tpu.vector_store %arg7[%c0_21, %c0_22], %40 {strides = array<i32>} : memref<112x256xf32, #tpu.memory_space<vmem>>, vector<16x256xf32>,
    %c2_i32 = arith.constant 2 : i32
    %42 = tpu.dynamic_rotate %37 by %c2_i32 dim 1 : vector<16x256xf32>, i32 -> vector<16x256xf32>
    %c16 = arith.constant 16 : index
    %c0_23 = arith.constant 0 : index
    %43 = vector.load %arg5[%c16, %c0_23] : memref<112x256xf32, #tpu.memory_space<vmem>>, vector<16x256xf32>
    %44 = arith.mulf %42, %43 : vector<16x256xf32>
    %c16_24 = arith.constant 16 : index
    %c0_25 = arith.constant 0 : index
    %45 = vector.load %arg7[%c16_24, %c0_25] : memref<112x256xf32, #tpu.memory_space<vmem>>, vector<16x256xf32>
    tpu.vector_store %arg7[%c16_24, %c0_25], %44 {strides = array<i32>} : memref<112x256xf32, #tpu.memory_space<vmem>>, vector<16x256xf32>,
    %c1_i32 = arith.constant 1 : i32
    %46 = tpu.dynamic_rotate %37 by %c1_i32 dim 1 : vector<16x256xf32>, i32 -> vector<16x256xf32>
    %c32 = arith.constant 32 : index
    %c0_26 = arith.constant 0 : index
    %47 = vector.load %arg5[%c32, %c0_26] : memref<112x256xf32, #tpu.memory_space<vmem>>, vector<16x256xf32>
    %48 = arith.mulf %46, %47 : vector<16x256xf32>
    %c32_27 = arith.constant 32 : index
    %c0_28 = arith.constant 0 : index
    %49 = vector.load %arg7[%c32_27, %c0_28] : memref<112x256xf32, #tpu.memory_space<vmem>>, vector<16x256xf32>
    tpu.vector_store %arg7[%c32_27, %c0_28], %48 {strides = array<i32>} : memref<112x256xf32, #tpu.memory_space<vmem>>, vector<16x256xf32>,
    %c48 = arith.constant 48 : index
    %c0_29 = arith.constant 0 : index
    %50 = vector.load %arg5[%c48, %c0_29] : memref<112x256xf32, #tpu.memory_space<vmem>>, vector<16x256xf32>
    %51 = arith.mulf %37, %50 : vector<16x256xf32>
    %c48_30 = arith.constant 48 : index
    %c0_31 = arith.constant 0 : index
    %52 = vector.load %arg7[%c48_30, %c0_31] : memref<112x256xf32, #tpu.memory_space<vmem>>, vector<16x256xf32>
    tpu.vector_store %arg7[%c48_30, %c0_31], %51 {strides = array<i32>} : memref<112x256xf32, #tpu.memory_space<vmem>>, vector<16x256xf32>,
    %c255_i32 = arith.constant 255 : i32
    %53 = tpu.dynamic_rotate %37 by %c255_i32 dim 1 : vector<16x256xf32>, i32 -> vector<16x256xf32>
    %c64 = arith.constant 64 : index
    %c0_32 = arith.constant 0 : index
    %54 = vector.load %arg5[%c64, %c0_32] : memref<112x256xf32, #tpu.memory_space<vmem>>, vector<16x256xf32>
    %55 = arith.mulf %53, %54 : vector<16x256xf32>
    %c64_33 = arith.constant 64 : index
    %c0_34 = arith.constant 0 : index
    %56 = vector.load %arg7[%c64_33, %c0_34] : memref<112x256xf32, #tpu.memory_space<vmem>>, vector<16x256xf32>
    tpu.vector_store %arg7[%c64_33, %c0_34], %55 {strides = array<i32>} : memref<112x256xf32, #tpu.memory_space<vmem>>, vector<16x256xf32>,
    %c254_i32 = arith.constant 254 : i32
    %57 = tpu.dynamic_rotate %37 by %c254_i32 dim 1 : vector<16x256xf32>, i32 -> vector<16x256xf32>
    %c80 = arith.constant 80 : index
    %c0_35 = arith.constant 0 : index
    %58 = vector.load %arg5[%c80, %c0_35] : memref<112x256xf32, #tpu.memory_space<vmem>>, vector<16x256xf32>
    %59 = arith.mulf %57, %58 : vector<16x256xf32>
    %c80_36 = arith.constant 80 : index
    %c0_37 = arith.constant 0 : index
    %60 = vector.load %arg7[%c80_36, %c0_37] : memref<112x256xf32, #tpu.memory_space<vmem>>, vector<16x256xf32>
    tpu.vector_store %arg7[%c80_36, %c0_37], %59 {strides = array<i32>} : memref<112x256xf32, #tpu.memory_space<vmem>>, vector<16x256xf32>,
    %c253_i32 = arith.constant 253 : i32
    %61 = tpu.dynamic_rotate %37 by %c253_i32 dim 1 : vector<16x256xf32>, i32 -> vector<16x256xf32>
    %c96 = arith.constant 96 : index
    %c0_38 = arith.constant 0 : index
    %62 = vector.load %arg5[%c96, %c0_38] : memref<112x256xf32, #tpu.memory_space<vmem>>, vector<16x256xf32>
    %63 = arith.mulf %61, %62 : vector<16x256xf32>
    %c96_39 = arith.constant 96 : index
    %c0_40 = arith.constant 0 : index
    %64 = vector.load %arg7[%c96_39, %c0_40] : memref<112x256xf32, #tpu.memory_space<vmem>>, vector<16x256xf32>
    tpu.vector_store %arg7[%c96_39, %c0_40], %63 {strides = array<i32>} : memref<112x256xf32, #tpu.memory_space<vmem>>, vector<16x256xf32>,
    %c0_41 = arith.constant 0 : index
    %c0_42 = arith.constant 0 : index
    %65 = vector.load %arg4[%c0_41, %c0_42] : memref<1x112xf32, #tpu.memory_space<vmem>>, vector<1x112xf32>
    %c0_43 = arith.constant 0 : index
    %c0_44 = arith.constant 0 : index
    %66 = vector.load %arg7[%c0_43, %c0_44] : memref<112x256xf32, #tpu.memory_space<vmem>>, vector<112x256xf32>
    %cst_45 = arith.constant dense<0.000000e+00> : vector<1x256xf32>
    %67 = tpu.matmul %65, %66, %cst_45 {dimension_numbers = #tpu.dot_dimension_numbers<[1], [0], [0], [1], [0, 0, 1, 1], [], []>, precision = #tpu.contract_precision<fp32>} : vector<1x112xf32>, vector<112x256xf32>, vector<1x256xf32> -> vector<1x256xf32>
    %68 = arith.negf %67 : vector<1x256xf32>
    %69 = math.exp %68 : vector<1x256xf32>
    %cst_46 = arith.constant 1.000000e+00 : f32
    %70 = vector.broadcast %cst_46 : f32 to vector<1x256xf32>
    %71 = arith.addf %70, %69 : vector<1x256xf32>
    %72 = arith.divf %70, %71 : vector<1x256xf32>
    %c0_47 = arith.constant 0 : index
    %c0_48 = arith.constant 0 : index
    %c0_49 = arith.constant 0 : index
    %73 = vector.load %arg1[%c0_47, %c0_48, %c0_49] : memref<1x32x256xf32, #tpu.memory_space<vmem>>, vector<1x32x256xf32>
    %74 = vector.shape_cast %73 : vector<1x32x256xf32> to vector<32x256xf32>
    %75 = vector.broadcast %20 : vector<32x1xf32> to vector<32x256xf32>
    %76 = arith.mulf %74, %75 : vector<32x256xf32>
    %77 = vector.broadcast %72 : vector<1x256xf32> to vector<32x256xf32>
    %78 = arith.mulf %76, %77 : vector<32x256xf32>
    %c0_50 = arith.constant 0 : index
    %c0_51 = arith.constant 0 : index
    %c0_52 = arith.constant 0 : index
    %79 = vector.load %arg6[%c0_50, %c0_51, %c0_52] : memref<1x32x256xf32, #tpu.memory_space<vmem>>, vector<1x32x256xf32>
    %80 = vector.shape_cast %79 : vector<1x32x256xf32> to vector<32x256xf32>
    %81 = vector.shape_cast %78 : vector<32x256xf32> to vector<1x32x256xf32>
    tpu.vector_store %arg6[%c0_50, %c0_51, %c0_52], %81 {strides = array<i32>} : memref<1x32x256xf32, #tpu.memory_space<vmem>>, vector<1x32x256xf32>,
    return
  }
  func.func @transform_0(%arg0: i32) -> (i32, i32, i32) {
    %c0_i32 = arith.constant 0 : i32
    %c0_i32_0 = arith.constant 0 : i32
    %c0_i32_1 = arith.constant 0 : i32
    return %arg0, %c0_i32, %c0_i32_0 : i32, i32, i32
  }
  func.func @transform_1(%arg0: i32) -> (i32, i32) {
    %c0_i32 = arith.constant 0 : i32
    %c0_i32_0 = arith.constant 0 : i32
    %c0_i32_1 = arith.constant 0 : i32
    return %c0_i32, %c0_i32_0 : i32, i32
  }
  func.func @transform_2(%arg0: i32) -> (i32, i32) {
    %c0_i32 = arith.constant 0 : i32
    %c0_i32_0 = arith.constant 0 : i32
    %c0_i32_1 = arith.constant 0 : i32
    return %c0_i32, %c0_i32_0 : i32, i32
  }
  func.func @transform_3(%arg0: i32) -> (i32, i32) {
    %c0_i32 = arith.constant 0 : i32
    %c0_i32_0 = arith.constant 0 : i32
    %c0_i32_1 = arith.constant 0 : i32
    return %c0_i32, %c0_i32_0 : i32, i32
  }
  func.func @transform_4(%arg0: i32) -> (i32, i32) {
    %c0_i32 = arith.constant 0 : i32
    %c0_i32_0 = arith.constant 0 : i32
    %c0_i32_1 = arith.constant 0 : i32
    return %c0_i32, %c0_i32_0 : i32, i32
  }
  func.func @transform_5(%arg0: i32) -> (i32, i32, i32) {
    %c0_i32 = arith.constant 0 : i32
    %c0_i32_0 = arith.constant 0 : i32
    %c0_i32_1 = arith.constant 0 : i32
    return %arg0, %c0_i32, %c0_i32_0 : i32, i32, i32
  }
}

</mosaic_0001>

<bundles_post_ra>
// kernel: tpu_custom_call.1
= control target key start
LH: loop header
LB: loop body
LE: loop exit
PB: predicated region body
PF: predicated region fallthrough
CT: control target
= control target key end

     0   :  { %10 = vsyncpa [#allocation4], 0  ;;  %s4979_s0 = inlined_call_operand.hbm [shape: f32[2,32,256], index: 0, kind: input, shape index: {}]   ;;  %s4980_s1 = inlined_call_operand.vmem [shape: f32[2,32], index: 1, kind: input, shape index: {}]   ;;  %s4981_s2 = inlined_call_operand.vmem [shape: f32[32,2], index: 2, kind: input, shape index: {}]   ;;  %s4982_s3 = inlined_call_operand.vmem [shape: f32[1,112], index: 3, kind: input, shape index: {}]   ;;  %s4983_s4 = inlined_call_operand.hbm [shape: f32[112,256], index: 4, kind: input, shape index: {}]   ;;  %s4984_s5 = inlined_call_operand.hbm [shape: f32[2,32,256], index: 5, kind: output, shape index: {}]  }
   0x1   :  { %12 = vsyncpa [#allocation4 + $0x1], 0 }
   0x2   :  { %13 = vsyncpa [#allocation7], 0 }
   0x3   :  { %14 = vsyncpa [#allocation5], 0 }
   0x4   :  { %16 = vsyncpa [#allocation5 + $0x1], 0  ;;  %s4060_s18 = smov 0   ;;  %s4062_s19 = smov 0  }
   0x5   :  { %s4064_s20 = smov 0   ;;  %s4066_s21 = smov 0  }
   0x6 LB: > { %s4081_s22 = sadd.s32 4294967295, %s4005_s21   ;;  %s3264_s23 = sadd.s32 4294967294, %s4005_s21   ;;  %s4005_s21 = sphi %s4066_s21, %s5071_s21   ;;  %s4001_s20 = sphi %s4064_s20, %s5070_s20   ;;  %s3997_s19 = sphi %s4062_s19, %s5069_s19   ;;  %s3993_s18 = sphi %s4060_s18, %s5068_s18  }
   0x7   : > { %p42_p0 = scmp.ne.s32.totalorder %s3997_s19, %s3993_s18  ;;  %p4985_p1 = scmp.eq.s32.totalorder %s4081_s22, 0 }
   0x8   : > { %p156_p3 = scmp.eq.s32.totalorder %s3264_s23, 1  ;;  %p3265_p5 = scmp.ge.s32.totalorder %s4005_s21, 1 }
   0x9   : > { %p4090_p4 = por %p4985_p1, %p42_p0  ;;  %p163_p7 = scmp.lt.s32.totalorder %s4005_s21, 3 }
   0xa   : > { %p4095_p6 = por %p156_p3, %p42_p0  ;;  %s4007_s27 = smov [#allocation6]  }
   0xb   : > { %s5014_s24 = scalar_select %p4090_p4, 1, 0 }
   0xc   : > { %s5015_s25 = scalar_select %p4095_p6, 1, 0 }
   0xd   : > { %p4100_p8 = pnand %p3265_p5, %p163_p7  ;;  %s184_s28 = sshll.u32 %s4007_s27, 4  ;;  %s4104_s28 = int_to_ptr.vmem [resolvable:$true] %s184_s28 }
   0xe   : > { %s4116_s30 = sadd.s32 1, %s4005_s21   ;;  %s29_s6 = sadd.s32 1, %s4001_s20 }
   0xf   : > { %s5016_s26 = scalar_select %p4100_p8, 1, 0 }
  0x10   : > { %p3774_p9 = pneg %p4100_p8  ;;  %s26_s7 = ssub.s32 %s4005_s21, %s4116_s30 }
  0x11   : > { %s3877_s10 = scalar_lea.hbm %s4983_s4, 3584 }
  0x12   : > { %p4111_p11 = pnand %p3774_p9, %p4985_p1  ;;  %p3878_p12 = scmp.ne.s32.totalorder %s4983_s4, %s3877_s10 }
  0x13   : > { %p3884_p5 = scmp.lt.u32.totalorder %s3877_s10, %s4983_s4 }
  0x14   : > { %p3879_p13 = pneg %p4111_p11 }
  0x16   : > { %p3880_p0 = pnand %p3879_p13, %p3878_p12 }
  0x18   : > { %p3881_p3 = pneg %p3880_p0 }
  0x1a   : > { %p3886_p7 = pnand %p3884_p5, %p3881_p3 }
  0x1c   : > { %3889 = shalt.err (!%p3886_p7)
}
  0x1d   : > { %s3890_s15 = scalar_lea.vmem %s4104_s28, 3584  ;;  %p3898_p2 = scmp.lt.s32.totalorder %s4104_s28, %s4104_s28 }
  0x1e   : > { %p3891_p9 = scmp.ne.s32.totalorder %s4104_s28, %s3890_s15  ;;  %p3899_p6 = scmp.lt.s32.totalorder %s3890_s15, %s3890_s15 }
  0x20   : > { %p3893_p10 = pnand %p3891_p9, %p3879_p13  ;;  %p3900_p4 = por %p3899_p6, %p3898_p2 }
  0x22   : > { %p3894_p1 = pneg %p3893_p10 }
  0x24   : > { %p3901_p8 = pnand %p3900_p4, %p3894_p1 }
  0x26   : > { %3904 = shalt.err (!%p3901_p8)
}
  0x27   : > { %s4008_s16 = smov 256   ;;  %s4009_s17 = smov 16  }
  0x28   : > { %3777 = dma.hbm_to_vmem [thread:$0]  (!%p4111_p11), %s4983_s4, 3584, %s4104_s28, [#allocation7], %s4008_s16, %s4008_s16, %s4009_s17  }
  0x29   : > { %p27_p1 = scmp.eq.s32.totalorder %s26_s7, 0  ;;  %p36_p2 = scmp.ne.s32.totalorder %s4001_s20, %s3997_s19 }
  0x2a   : > { %p37_p4 = scmp.eq.s32.totalorder %s4005_s21, 0  ;;  %p3787_p6 = scmp.lt.s32.totalorder %s4005_s21, 2 }
  0x2b   : > { %s4150_s8 = scalar_select %p27_p1, %s4001_s20, %s29_s6  }
  0x2c   : > { %p38_p8 = por %p37_p4, %p36_p2  ;;  %p5018_p10 = scmp.eq.s32.totalorder %s4081_s22, 1 }
  0x2d   : > { %s198_s29 = sand.u32 1, %s4001_s20   ;;  %s3289_s10 = sshll.u32 %s4005_s21, 10 }
  0x2e   : > { %p4154_p12 = por %p5018_p10, %p36_p2  ;;  %s3268_s11 = sshll.u32 %s198_s29, 6 }
  0x2f   : > { %s4163_s14 = scalar_lea.hbm %s4979_s0, %s3289_s10  ;;  %s202_s28 = scalar_lea.vmem [#allocation3], %s3268_s11 }
  0x30   : > { %s209_s6 = sshll.u32 %s202_s28, 4  ;;  %p4165_p11 = pnand %p3787_p6, %p38_p8  ;;  %s4169_s6 = int_to_ptr.vmem [resolvable:$true] %s209_s6 }
  0x31   : > { %s4171_s15 = scalar_lea.sflag [#allocation4], %s198_s29  ;;  %s3905_s23 = scalar_lea.hbm %s4163_s14, 1024 }
  0x32   : > { %p3906_p13 = scmp.ne.s32.totalorder %s4163_s14, %s3905_s23  ;;  %p3907_p0 = pneg %p4165_p11 }
  0x33   : > { %s3910_s11 = scalar_lea.hbm %s4979_s0, 2048  ;;  %p3911_p7 = scmp.lt.u32.totalorder %s4163_s14, %s4979_s0 }
  0x34   : > { %p3908_p3 = pnand %p3907_p0, %p3906_p13  ;;  %p3912_p9 = scmp.lt.u32.totalorder %s3910_s11, %s3905_s23 }
  0x35   : > { %p3914_p2 = scmp.lt.u32.totalorder %s3905_s23, %s4163_s14 }
  0x36   : > { %p3909_p5 = pneg %p3908_p3  ;;  %p3913_p1 = por %p3912_p9, %p3911_p7 }
  0x38   : > { %p3915_p4 = por %p3914_p2, %p3913_p1 }
  0x3a   : > { %p3916_p6 = pnand %p3915_p4, %p3909_p5 }
  0x3c   : > { %3919 = shalt.err (!%p3916_p6)
}
  0x3d   : > { %s3920_s29 = scalar_lea.vmem %s4169_s6, 1024  ;;  %s4010_s28 = smov [#allocation3]  }
  0x3e   : > { %p3921_p8 = scmp.ne.s32.totalorder %s4169_s6, %s3920_s29  ;;  %s3925_s27 = sshll.u32 %s4010_s28, 4  ;;  %s3926_s27 = int_to_ptr.vmem [resolvable:$false] %s3925_s27 }
  0x3f   : > { %s3927_s10 = scalar_lea.vmem %s3926_s27, 2048  ;;  %p3928_p3 = scmp.lt.s32.totalorder %s4169_s6, %s3926_s27 }
  0x40   : > { %p3923_p10 = pnand %p3921_p8, %p3907_p0  ;;  %p3929_p7 = scmp.lt.s32.totalorder %s3927_s10, %s3920_s29 }
  0x42   : > { %p3924_p13 = pneg %p3923_p10  ;;  %p3930_p9 = por %p3929_p7, %p3928_p3 }
  0x44   : > { %p3931_p1 = pnand %p3930_p9, %p3924_p13 }
  0x46   : > { %3934 = shalt.err (!%p3931_p1)
}
  0x47   : > { %3781 = dma.hbm_to_vmem [thread:$0]  (!%p4165_p11), %s4163_s14, 1024, %s4169_s6, %s4171_s15, %s4008_s16, %s4008_s16, %s4009_s17  }
  0x48   : > { %p5021_p0 = scmp.ne.s32.totalorder %s5016_s26, 0 }
  0x4a   : > { %221 = sbr.rel (%p5021_p0) target bundleno = 1969 (0x7b1), region = 40 }
  0x51   : > { %s4205_s23 = sand.u32 1, %s3997_s19   ;;  %p5022_p5 = scmp.ne.s32.totalorder %s5014_s24, 0 }
  0x52   : > { %s3272_s11 = sshll.u32 %s4205_s23, 6  ;;  %s224_s12 = scalar_lea.sflag [#allocation4], %s4205_s23 }
  0x53   : > { %s4211_s7 = scalar_lea.vmem [#allocation3], %s3272_s11 }
  0x54   : > { %3980 = dma.done.wait (%p5022_p5), %s224_s12, 1024  }
  0x55   : > { %3982 = vsyncadd (%p5022_p5), %s224_s12, 4294966272  ;;  %p5023_p11 = scmp.eq.s32.totalorder %s4081_s22, 0 }
  0x57   : > { %3984 = dma.done.wait (%p5023_p11), [#allocation7], 3584   ;;  %p5024_p2 = pmov %p5023_p11 }
  0x58   : > { %v4222_v0 = vld [vmem:[%s4211_s7] sm:$0xff]  ;;  %v4225_v1 = vld [vmem:[%s4211_s7 + $0x8] sm:$0xff]  ;;  %v4228_v2 = vld [vmem:[%s4211_s7 + $0x10] sm:$0xff]  ;;  %v4011_v24 = vmov 0.0|0.0   ;;  %vm4012_vm0 = vmmov 0   ;;  %v4991_v25 = vmov 0.0  }
  0x59   : > { %3986 = vsyncadd (%p5024_p2), [#allocation7], 4294963712  ;;  %v286_v3 = vmax.f32 %v4222_v0, %v4225_v1  ;;  %v266_v4 = vmul.f32 0.00390625, %v4222_v0  ;;  %v267_v5 = vmul.f32 0.00390625, %v4225_v1  ;;  %v4235_v6 = vld [vmem:[%s4211_s7 + $0x18] sm:$0xff]  ;;  %v268_v7 = vmul.f32 0.00390625, %v4228_v2  ;;  %3465 = vmatprep.subr.bf16.mxu1 %v4011_v24  ;;  %3471 = vmatprep.subr.bf16.mxu0 %v4011_v24 }
  0x5a   : > { %v4239_v8 = vld [vmem:[%s4211_s7 + $0x30] sm:$0xff]  ;;  %v4242_v9 = vld [vmem:[%s4211_s7 + $0x38] sm:$0xff]  ;;  %v269_v10 = vmul.f32 0.00390625, %v4235_v6  ;;  %v4246_v11 = vld [vmem:[%s4211_s7 + $0x20] sm:$0xff]  ;;  %v289_v14 = vmax.f32 %v4228_v2, %v4235_v6  ;;  %3370 = vmatprep.mubr.msk.f32.mxu0 %vm4012_vm0, %v4991_v25  ;;  %3359 = vmatprep.mubr.msk.f32.mxu1 %vm4012_vm0, %v4991_v25  ;;  %vm298_vm1 = vcmask 7168   ;;  %vm304_vm2 = vcmask 261120  }
  0x5b   : > { %v4249_v12 = vld [vmem:[%s4211_s7 + $0x28] sm:$0xff]  ;;  %287 = vmax.xlane.f32.xlu1 %v286_v3  ;;  %v274_v13 = vadd.f32 %v267_v5, %v266_v4  ;;  %v272_v15 = vmul.f32 0.00390625, %v4239_v8  ;;  %v273_v16 = vmul.f32 0.00390625, %v4242_v9  ;;  %v270_v18 = vmul.f32 0.00390625, %v4246_v11  ;;  %v303_v29 = vld [vmem:[%s4980_s1] sm:$0x3] }
  0x5c   : > { %v277_v17 = vadd.f32 %v269_v10, %v268_v7  ;;  %v271_v19 = vmul.f32 0.00390625, %v4249_v12  ;;  %v295_v22 = vmax.f32 %v4239_v8, %v4242_v9  ;;  %v292_v23 = vmax.f32 %v4246_v11, %v4249_v12  ;;  %s4014_s27 = smov 127   ;;  %s4017_s10 = smov 32  }
  0x5d   : > { %275 = vadd.xlane.f32.xlu0 %v274_v13  ;;  %v283_v20 = vadd.f32 %v273_v16, %v272_v15  ;;  %v306_v34 = vsel %vm304_vm2, %v303_v29, 0  ;;  %vm798_vm3 = vcmask 15360   ;;  %vm811_vm4 = vcmask 1041408   ;;  %s4018_s12 = smov 96   ;;  %s4019_s24 = smov 16  }
  0x5e   : > { %v280_v21 = vadd.f32 %v271_v19, %v270_v18  ;;  %v4273_v39 = vand.u32 4294901760, %v306_v34  ;;  %vm2026_vm5 = vcmask 1040384   ;;  %s4020_s26 = smov 80   ;;  %s4021_s16 = smov 48   ;;  %vm2105_vm11 = vcmask 1043456  }
  0x5f   : > { %290 = vmax.xlane.f32.xlu1 %v289_v14  ;;  %s4022_s17 = smov 112   ;;  %vm2108_vm12 = vcmask 1045504   ;;  %s4023_s14 = smov 3  }
  0x60   : > { %v378_v43 = vsub.f32 %v306_v34, %v4273_v39  ;;  %s4024_s6 = smov 2   ;;  %s4025_s15 = smov 1  }
  0x61   : > { %278 = vadd.xlane.f32.xlu0 %v277_v17  ;;  %v794_v17 = vld [vmem:[%s4981_s2] sm:$0xff]  ;;  %s4026_s13 = smov 126   ;;  %s4027_s29 = smov 125  }
  0x62   : > { %v379_v48 = vand.u32 4294901760, %v378_v43  ;;  %v800_v18 = vsel %vm798_vm3, %v794_v17, 0 }
  0x63   : > { %284 = vadd.xlane.f32.xlu1 %v283_v20  ;;  %v4304_v19 = vand.u32 4294901760, %v800_v18 }
  0x64   : > { %v380_v53 = vsub.f32 %v378_v43, %v379_v48 }
  0x65   : > { %281 = vadd.xlane.f32.xlu0 %v280_v21  ;;  %v882_v20 = vsub.f32 %v800_v18, %v4304_v19 }
  0x66   : > { %v381_v62 = vand.u32 4294901760, %v380_v53 }
  0x67   : > { %296 = vmax.xlane.f32.xlu1 %v295_v22  ;;  %v883_v21 = vand.u32 4294901760, %v882_v20 }
  0x69   : > { %293 = vmax.xlane.f32.xlu0 %v292_v23  ;;  %v884_v22 = vsub.f32 %v882_v20, %v883_v21 }
  0x6b   : > { %v885_v23 = vand.u32 4294901760, %v884_v22 }
  0xe8   : > { %v288_v26 = vpop.xlane.xlu1 %287 }
  0xea   : > { %v276_v27 = vpop.xlane.xlu0 %275 }
  0xeb   : > { %v299_v28 = vsel %vm298_vm1, %v276_v27, %v288_v26  ;;  %v795_v27 = vld [vmem:[%s4981_s2 + $0x8] sm:$0xff] }
  0xec   : > { %v309_v30 = vand.u32 4294901760, %v299_v28  ;;  %v291_v31 = vpop.xlane.xlu1 %290  ;;  %v803_v29 = vsel %vm798_vm3, %v795_v27, 0 }
  0xee   : > { %v389_v32 = vsub.f32 %v299_v28, %v309_v30  ;;  %v279_v33 = vpop.xlane.xlu0 %278  ;;  %v796_v28 = vld [vmem:[%s4981_s2 + $0x10] sm:$0xff] }
  0xef   : > { %v300_v35 = vsel %vm298_vm1, %v279_v33, %v291_v31  ;;  %v797_v31 = vld [vmem:[%s4981_s2 + $0x18] sm:$0xff] }
  0xf0   : > { %v312_v36 = vand.u32 4294901760, %v300_v35  ;;  %v285_v37 = vpop.xlane.xlu1 %284  ;;  %v390_v38 = vand.u32 4294901760, %v389_v32  ;;  %v809_v34 = vsel %vm798_vm3, %v797_v31, 0 }
  0xf2   : > { %v396_v40 = vsub.f32 %v300_v35, %v312_v36  ;;  %v282_v41 = vpop.xlane.xlu0 %281  ;;  %v3466_v42 = vpack.c.bf16 %v312_v36, %v309_v30  ;;  %v391_v45 = vsub.f32 %v389_v32, %v390_v38  ;;  %v806_v30 = vsel %vm798_vm3, %v796_v28, 0 }
  0xf3   : > { %v901_v33 = vand.u32 4294901760, %v806_v30  ;;  %v911_v36 = vand.u32 4294901760, %v809_v34 }
  0xf4   : > { %v297_v44 = vpop.xlane.xlu1 %296  ;;  %3467 = vmatpush3.bf16.msra.mxu1 %v3466_v42  ;;  %v397_v46 = vand.u32 4294901760, %v396_v40  ;;  %v392_v56 = vand.u32 4294901760, %v391_v45  ;;  %v3478_v13 = vpack.c.bf16 %v396_v40, %v389_v32  ;;  %v891_v32 = vand.u32 4294901760, %v803_v29 }
  0xf5   : > { %v302_v47 = vsel %vm298_vm1, %v285_v37, %v297_v44  ;;  %3468 = vmatprep.subr.bf16.mxu1 %v4011_v24  ;;  %v902_v37 = vsub.f32 %v806_v30, %v901_v33 }
  0xf6   : > { %v318_v49 = vand.u32 4294901760, %v302_v47  ;;  %v294_v50 = vpop.xlane.xlu0 %293  ;;  %v398_v51 = vsub.f32 %v396_v40, %v397_v46  ;;  %v3490_v15 = vpack.c.bf16 %v397_v46, %v390_v38  ;;  %v892_v35 = vsub.f32 %v803_v29, %v891_v32 }
  0xf7   : > { %v301_v52 = vsel %vm298_vm1, %v282_v41, %v294_v50  ;;  %v903_v40 = vand.u32 4294901760, %v902_v37  ;;  %vm2308_vm1 = vcmask 916480  }
  0xf8   : > { %v410_v54 = vsub.f32 %v302_v47, %v318_v49  ;;  %v315_v55 = vand.u32 4294901760, %v301_v52  ;;  %v399_v57 = vand.u32 4294901760, %v398_v51  ;;  %v893_v38 = vand.u32 4294901760, %v892_v35 }
  0xf9   : > { %v904_v47 = vsub.f32 %v902_v37, %v903_v40 }
  0xfa   : > { %v411_v58 = vand.u32 4294901760, %v410_v54  ;;  %v403_v59 = vsub.f32 %v301_v52, %v315_v55  ;;  %v3469_v60 = vpack.c.bf16 %v318_v49, %v315_v55  ;;  %v3472_v61 = vpack.c.bf16 %v399_v57, %v392_v56 }
  0xfb   : > { %v894_v44 = vsub.f32 %v892_v35, %v893_v38  ;;  %v905_v52 = vand.u32 4294901760, %v904_v47 }
  0xfc   : > { %v404_v63 = vand.u32 4294901760, %v403_v59  ;;  %3470 = vmatpush3.bf16.msra.mxu1 %v3469_v60  ;;  %3473 = vmatpush3.bf16.msra.mxu0 %v3472_v61  ;;  %v412_v3 = vsub.f32 %v410_v54, %v411_v58  ;;  %v3481_v14 = vpack.c.bf16 %v410_v54, %v403_v59 }
  0xfd   : > { %3474 = vmatprep.subr.bf16.mxu0 %v4011_v24  ;;  %v895_v50 = vand.u32 4294901760, %v894_v44 }
  0xfe   : > { %v405_v4 = vsub.f32 %v403_v59, %v404_v63  ;;  %v413_v7 = vand.u32 4294901760, %v412_v3  ;;  %v3493_v16 = vpack.c.bf16 %v411_v58, %v404_v63 }
  0xff   : > { %3360 = vmatmul.mubr.f32.vlgmr.msra.gmra.mrb[0].mxu1 %v381_v62  ;;  %v4015_v62 = vmov 0  }
 0x100   : > { %v406_v5 = vand.u32 4294901760, %v405_v4  ;;  %3419 = vmatprep.mubr.f32.mxu1 %v885_v23  ;;  %3843 = vset.pattern.permute.xlu1 %v4015_v62 }
 0x101   : > { %3844 = vset.pattern.permute.xlu0 %v4015_v62 }
 0x102   : > { %v3475_v10 = vpack.c.bf16 %v413_v7, %v406_v5 }
 0x104   : > { %3476 = vmatpush3.bf16.msra.mxu0 %v3475_v10 }
 0x105   : > { %3477 = vmatprep.subr.bf16.mxu0 %v4011_v24 }
 0x107   : > { %3371 = vmatmul.mubr.f32.vlgmr.msra.gmra.mrb[0].mxu0 %v4273_v39 }
 0x108   : > { %3479 = vmatpush3.bf16.msra.mxu0 %v3478_v13  ;;  %3381 = vmatprep.mubr.msk.f32.mxu0 %vm4012_vm0, %v4991_v25 }
 0x109   : > { %3480 = vmatprep.subr.bf16.mxu0 %v4011_v24 }
 0x10c   : > { %3482 = vmatpush3.bf16.msra.mxu0 %v3481_v14 }
 0x10d   : > { %3483 = vmatprep.subr.bf16.mxu0 %v4011_v24 }
 0x10f   : > { %3382 = vmatmul.mubr.f32.vlgmr.msra.gmra.mrb[0].mxu0 %v378_v43 }
 0x110   : > { %3485 = vmatpush3.bf16.msra.mxu0 %v3466_v42  ;;  %3392 = vmatprep.mubr.msk.f32.mxu0 %vm4012_vm0, %v4991_v25 }
 0x111   : > { %3486 = vmatprep.subr.bf16.mxu0 %v4011_v24 }
 0x114   : > { %3488 = vmatpush3.bf16.msra.mxu0 %v3469_v60 }
 0x115   : > { %3489 = vmatprep.subr.bf16.mxu0 %v4011_v24 }
 0x117   : > { %3393 = vmatmul.mubr.f32.vlgmr.msra.gmra.mrb[0].mxu0 %v379_v48 }
 0x118   : > { %3491 = vmatpush3.bf16.msra.mxu0 %v3490_v15  ;;  %3403 = vmatprep.mubr.msk.f32.mxu0 %vm4012_vm0, %v4991_v25 }
 0x119   : > { %3492 = vmatprep.subr.bf16.mxu0 %v4011_v24 }
 0x11c   : > { %3494 = vmatpush3.bf16.msra.mxu0 %v3493_v16 }
 0x11d   : > { %3495 = vmatprep.subr.bf16.mxu0 %v4011_v24 }
 0x11f   : > { %3404 = vmatmul.mubr.f32.vlgmr.msra.gmra.mrb[0].mxu0 %v4273_v39 }
 0x120   : > { %3497 = vmatpush3.bf16.msra.mxu0 %v3466_v42  ;;  %3414 = vmatprep.mubr.msk.f32.mxu0 %vm4012_vm0, %v4991_v25 }
 0x121   : > { %3498 = vmatprep.subr.bf16.mxu0 %v4011_v24 }
 0x124   : > { %3500 = vmatpush3.bf16.msra.mxu0 %v3469_v60 }
 0x127   : > { %3415 = vmatmul.mubr.f32.vlgmr.msra.gmra.mrb[0].mxu0 %v4273_v39  ;;  %v912_v39 = vsub.f32 %v809_v34, %v911_v36 }
 0x128   : > { %2748 = vmatprep.mubr.f32.mxu0 %v4991_v25 }
 0x129   : > { %v913_v45 = vand.u32 4294901760, %v912_v39 }
 0x12b   : > { %v914_v51 = vsub.f32 %v912_v39, %v913_v45 }
 0x12d   : > { %v915_v54 = vand.u32 4294901760, %v914_v51 }
 0x1d2   : > { %v383_v24 = vpop.f32.mrb[0].mxu1 }
 0x1d3   : > { %v3361_v26 = vpop.f32.mrb[1].mxu1 }
 0x1fa   : > { %v789_v41 = vpop.f32.mrb[0].mxu0 }
 0x1fb   : > { %v3717_v42 = vadd.f32 %v789_v41, %v383_v24  ;;  %v3416_v43 = vpop.f32.mrb[1].mxu0 }
 0x1fd   : > { %v793_v46 = vmax.f32 %v3717_v42, 0.0 }
 0x1ff   : > { %v813_v48 = vsel %vm811_vm4, %v793_v46, 0 }
 0x200   : > { %v816_v49 = vand.u32 4294901760, %v813_v48 }
 0x202   : > { %v923_v53 = vsub.f32 %v813_v48, %v816_v49  ;;  %3417 = vmatprep.subr.mxu1 %v816_v49 }
 0x203   : > { %3418 = vmatpush3.msra.mxu1 %v816_v49 }
 0x204   : > { %3420 = vmatmul.mubr.f32.vlgmr.msra.gmra.mrb[2].mxu1 %v895_v50  ;;  %v924_v55 = vand.u32 4294901760, %v923_v53 }
 0x205   : > { %3422 = vmatprep.mubr.f32.mxu1 %v905_v52 }
 0x206   : > { %v925_v56 = vsub.f32 %v923_v53, %v924_v55 }
 0x208   : > { %3423 = vmatmul.mubr.f32.gmra.mrb[4].mxu1 %v915_v54  ;;  %v926_v57 = vand.u32 4294901760, %v925_v56 }
 0x209   : > { %3427 = vmatprep.mubr.f32.mxu1 %v4304_v19 }
 0x20a   : > { %3425 = vmatprep.subr.mxu1 %v926_v57 }
 0x20b   : > { %3426 = vmatpush3.msra.mxu1 %v926_v57 }
 0x20c   : > { %3428 = vmatmul.mubr.f32.vlgmr.msra.gmra.mrb[2].mxu1 %v891_v32  ;;  %3433 = vmatprep.subr.mxu1 %v923_v53 }
 0x20d   : > { %3434 = vmatpush3.msra.mxu1 %v923_v53  ;;  %3430 = vmatprep.mubr.f32.mxu1 %v901_v33 }
 0x20e   : > { %3441 = vmatprep.subr.mxu1 %v816_v49 }
 0x210   : > { %3431 = vmatmul.mubr.f32.gmra.mrb[4].mxu1 %v911_v36 }
 0x211   : > { %3435 = vmatprep.mubr.f32.mxu1 %v882_v20 }
 0x214   : > { %3436 = vmatmul.mubr.f32.vlgmr.msra.gmra.mrb[2].mxu1 %v892_v35 }
 0x215   : > { %3442 = vmatpush3.msra.mxu1 %v816_v49  ;;  %3438 = vmatprep.mubr.f32.mxu1 %v902_v37 }
 0x216   : > { %3449 = vmatprep.subr.mxu1 %v924_v55 }
 0x218   : > { %3439 = vmatmul.mubr.f32.gmra.mrb[4].mxu1 %v912_v39 }
 0x219   : > { %3443 = vmatprep.mubr.f32.mxu1 %v883_v21 }
 0x21c   : > { %3444 = vmatmul.mubr.f32.vlgmr.msra.gmra.mrb[2].mxu1 %v893_v38 }
 0x21d   : > { %3450 = vmatpush3.msra.mxu1 %v924_v55  ;;  %3446 = vmatprep.mubr.f32.mxu1 %v903_v40 }
 0x21e   : > { %3457 = vmatprep.subr.mxu1 %v816_v49 }
 0x220   : > { %3447 = vmatmul.mubr.f32.gmra.mrb[4].mxu1 %v913_v45 }
 0x221   : > { %3451 = vmatprep.mubr.f32.mxu1 %v4304_v19 }
 0x224   : > { %3452 = vmatmul.mubr.f32.vlgmr.msra.gmra.mrb[2].mxu1 %v891_v32 }
 0x225   : > { %3458 = vmatpush3.msra.mxu1 %v816_v49  ;;  %3454 = vmatprep.mubr.f32.mxu1 %v901_v33 }
 0x228   : > { %3455 = vmatmul.mubr.f32.gmra.mrb[4].mxu1 %v911_v36 }
 0x229   : > { %3459 = vmatprep.mubr.f32.mxu1 %v4304_v19 }
 0x22c   : > { %3460 = vmatmul.mubr.f32.vlgmr.msra.gmra.mrb[2].mxu1 %v891_v32  ;;  %v1463_v32 = vsel %vm304_vm2, 0.03125, %v4015_v62 }
 0x22d   : > { %3462 = vmatprep.mubr.f32.mxu1 %v901_v33  ;;  %v4341_v37 = vsub.f32 %v1463_v32, %v1463_v32 }
 0x22f   : > { %v1540_v44 = vand.u32 4294901760, %v4341_v37 }
 0x230   : > { %3463 = vmatmul.mubr.f32.gmra.mrb[4].mxu1 %v911_v36 }
 0x231   : > { %1537 = vmatprep.mubr.f32.mxu1 %v4991_v25  ;;  %v1541_v57 = vsub.f32 %v4341_v37, %v1540_v44 }
 0x2ff   : > { %v3461_v58 = vpop.f32.mrb[2].mxu1 }
 0x300   : > { %1396 = vrot.lane.b32.xlu1 %v3461_v58, %s4014_s27  ;;  %v1368_v59 = vpop.f32.mrb[3].mxu1 }
 0x301   : > { %1394 = vrot.lane.b32.xlu0 %v1368_v59, %s4014_s27 }
 0x303   : > { %v3464_v60 = vpop.f32.mrb[4].mxu1 }
 0x304   : > { %v1380_v61 = vpop.f32.mrb[5].mxu1 }
 0x305   : > { %1398 = vrot.lane.b32.xlu1 %v1380_v61, %s4014_s27 }
 0x309   : > { %1400 = vrot.lane.b32.xlu1 %v3464_v60, %s4014_s27 }
 0x372   : > { %v1397_v63 = vpop.permute.xlu1 %1396 }
 0x373   : > { %v1407_v3 = vadd.f32 %v3461_v58, %v1397_v63  ;;  %v1395_v4 = vpop.permute.xlu0 %1394 }
 0x374   : > { %v1406_v5 = vadd.f32 %v1395_v4, %v1368_v59 }
 0x375   : > { %v3276_v7 = vmul.f32 -1.442695, %v1407_v3 }
 0x376   : > { %v3275_v10 = vmul.f32 -1.442695, %v1406_v5 }
 0x377   : > { %3845 = vpow2.f32 %v3276_v7  ;;  %v1399_v13 = vpop.permute.xlu1 %1398 }
 0x378   : > { %3847 = vpow2.f32 %v3275_v10  ;;  %v1408_v14 = vadd.f32 %v1399_v13, %v1380_v61 }
 0x37a   : > { %v3277_v15 = vmul.f32 -1.442695, %v1408_v14 }
 0x37b   : > { %v1401_v16 = vpop.permute.xlu1 %1400 }
 0x37c   : > { %3849 = vpow2.f32 %v3277_v15  ;;  %v1409_v17 = vadd.f32 %v3464_v60, %v1401_v16 }
 0x37e   : > { %v3278_v18 = vmul.f32 -1.442695, %v1409_v17 }
 0x380   : > { %3851 = vpow2.f32 %v3278_v18  ;;  %v1542_v18 = vand.u32 4294901760, %v1541_v57 }
 0x381   : > { %v3846_v19 = vpop.eup %3845 }
 0x382   : > { %v3848_v20 = vpop.eup %3847  ;;  %v1423_v21 = vadd.f32 1.0, %v3846_v19 }
 0x383   : > { %v1422_v22 = vadd.f32 1.0, %v3848_v20 }
 0x384   : > { %3853 = vrcp.f32 %v1423_v21 }
 0x385   : > { %3855 = vrcp.f32 %v1422_v22 }
 0x386   : > { %v3850_v23 = vpop.eup %3849 }
 0x387   : > { %v1424_v24 = vadd.f32 1.0, %v3850_v23 }
 0x389   : > { %3857 = vrcp.f32 %v1424_v24 }
 0x38a   : > { %v3852_v26 = vpop.eup %3851 }
 0x38b   : > { %v1425_v27 = vadd.f32 1.0, %v3852_v26 }
 0x38d   : > { %3859 = vrcp.f32 %v1425_v27 }
 0x38e   : > { %v3854_v28 = vpop.eup %3853 }
 0x38f   : > { %v3856_v29 = vpop.eup %3855  ;;  %1441 = vperm.xlu1 %3843, %v3854_v28  }
 0x390   : > { %1436 = vperm.xlu0 %3844, %v3856_v29  }
 0x393   : > { %v3858_v30 = vpop.eup %3857 }
 0x394   : > { %1446 = vperm.xlu1 %3843, %v3858_v30  }
 0x397   : > { %v3860_v31 = vpop.eup %3859 }
 0x398   : > { %1451 = vperm.xlu0 %3844, %v3860_v31  }
 0x40e   : > { %v4329_v33 = vpop.permute.xlu1 %1441 }
 0x40f   : > { %5025 = vst [vmem:[#allocation12_spill] sm:$0xff] %v4329_v33  ;;  %v4333_v34 = vmul.f32 %v4329_v33, %v4228_v2  ;;  %v4337_v35 = vmul.f32 %v4329_v33, %v4235_v6  ;;  %v4339_v36 = vpop.permute.xlu0 %1436 }
 0x410   : > { %5026 = vst [vmem:[#allocation13_spill] sm:$0xff] %v4339_v36  ;;  %v4345_v38 = vmul.f32 %v4339_v36, %v4222_v0  ;;  %v4349_v39 = vmul.f32 %v4339_v36, %v4225_v1 }
 0x411   : > { %v1469_v40 = vand.u32 4294901760, %v4337_v35  ;;  %v1471_v2 = vand.u32 4294901760, %v4333_v34 }
 0x412   : > { %v1465_v41 = vand.u32 4294901760, %v4349_v39  ;;  %v1467_v6 = vand.u32 4294901760, %v4345_v38 }
 0x413   : > { %v4355_v42 = vpop.permute.xlu1 %1446  ;;  %v4358_v43 = vsub.f32 %v4337_v35, %v1469_v40  ;;  %v4361_v0 = vsub.f32 %v4333_v34, %v1471_v2 }
 0x414   : > { %5027 = vst [vmem:[#allocation14_spill] sm:$0xff] %v4355_v42  ;;  %v1458_v1 = vmul.f32 %v4355_v42, %v4246_v11  ;;  %v1459_v45 = vmul.f32 %v4355_v42, %v4249_v12  ;;  %v4368_v46 = vpack.c.bf16 %v1469_v40, %v1465_v41  ;;  %v4371_v47 = vsub.f32 %v4349_v39, %v1465_v41 }
 0x415   : > { %v4373_v48 = vpack.c.bf16 %v1471_v2, %v1467_v6  ;;  %v4376_v49 = vsub.f32 %v4345_v38, %v1467_v6  ;;  %v1563_v54 = vand.u32 4294901760, %v4358_v43  ;;  %v1569_v56 = vand.u32 4294901760, %v4361_v0 }
 0x416   : > { %v2008_v50 = vmax.f32 %v4345_v38, %v1458_v1  ;;  %v2017_v51 = vmax.f32 %v4349_v39, %v1459_v45  ;;  %v1473_v52 = vand.u32 4294901760, %v1459_v45  ;;  %v1475_v53 = vand.u32 4294901760, %v1458_v1  ;;  %3502 = vmatprep.subr.bf16.mxu1 %v4368_v46 }
 0x417   : > { %v4381_v11 = vpop.permute.xlu0 %1451  ;;  %v1551_v12 = vand.u32 4294901760, %v4371_v47  ;;  %v1557_v55 = vand.u32 4294901760, %v4376_v49  ;;  %3504 = vmatpush1.bf16.msra.mxu1 %v4373_v48  ;;  %v1564_v63 = vsub.f32 %v4358_v43, %v1563_v54  ;;  %v1570_v13 = vsub.f32 %v4361_v0, %v1569_v56 }
 0x418   : > { %5028 = vst [vmem:[#allocation15_spill] sm:$0xff] %v4381_v11  ;;  %v1460_v58 = vmul.f32 %v4381_v11, %v4239_v8  ;;  %v1461_v59 = vmul.f32 %v4381_v11, %v4242_v9  ;;  %v4395_v60 = vsub.f32 %v1459_v45, %v1473_v52  ;;  %v4397_v61 = vsub.f32 %v1458_v1, %v1475_v53 }
 0x419   : > { %v1552_v62 = vsub.f32 %v4371_v47, %v1551_v12  ;;  %v1565_v7 = vand.u32 4294901760, %v1564_v63  ;;  %v1558_v10 = vsub.f32 %v4376_v49, %v1557_v55  ;;  %v1571_v20 = vand.u32 4294901760, %v1570_v13 }
 0x41a   : > { %v2009_v3 = vmax.f32 %v4333_v34, %v1460_v58  ;;  %v2018_v8 = vmax.f32 %v4337_v35, %v1461_v59  ;;  %v1477_v4 = vand.u32 4294901760, %v1461_v59  ;;  %v1479_v9 = vand.u32 4294901760, %v1460_v58 }
 0x41b   : > { %v1553_v5 = vand.u32 4294901760, %v1552_v62  ;;  %v1559_v19 = vand.u32 4294901760, %v1558_v10  ;;  %v1575_v21 = vand.u32 4294901760, %v4395_v60  ;;  %v1581_v24 = vand.u32 4294901760, %v4397_v61 }
 0x41c   : > { %v4413_v14 = vpack.c.bf16 %v1477_v4, %v1473_v52  ;;  %v1586_v15 = vsub.f32 %v1461_v59, %v1477_v4  ;;  %v3507_v16 = vpack.c.bf16 %v1479_v9, %v1475_v53  ;;  %v1592_v17 = vsub.f32 %v1460_v58, %v1479_v9 }
 0x41d   : > { %v3509_v22 = vpack.c.bf16 %v1565_v7, %v1553_v5  ;;  %v1576_v27 = vsub.f32 %v4395_v60, %v1575_v21  ;;  %v1582_v29 = vsub.f32 %v4397_v61, %v1581_v24  ;;  %v3511_v31 = vpack.c.bf16 %v1571_v20, %v1559_v19 }
 0x41e   : > { %3506 = vmatprep.subr.bf16.mxu1 %v4413_v14  ;;  %v1587_v23 = vand.u32 4294901760, %v1586_v15  ;;  %v1593_v26 = vand.u32 4294901760, %v1592_v17  ;;  %v2010_v39 = vmax.f32 %v2008_v50, %v2009_v3  ;;  %v2019_v40 = vmax.f32 %v2017_v51, %v2018_v8 }
 0x41f   : > { %3508 = vmatpush1.bf16.msra.mxu1 %v3507_v16  ;;  %v1577_v32 = vand.u32 4294901760, %v1576_v27  ;;  %v1583_v35 = vand.u32 4294901760, %v1582_v29  ;;  %v3517_v6 = vpack.c.bf16 %v4358_v43, %v4371_v47  ;;  %v3519_v1 = vpack.c.bf16 %v4361_v0, %v4376_v49 }
 0x420   : > { %3510 = vmatprep.subr.bf16.mxu1 %v3509_v22  ;;  %v1588_v28 = vsub.f32 %v1586_v15, %v1587_v23  ;;  %v1594_v30 = vsub.f32 %v1592_v17, %v1593_v26  ;;  %v4016_v45 = vmov 0.03125   ;;  %v3521_v52 = vpack.c.bf16 %v1586_v15, %v4395_v60 }
 0x421   : > { %v3523_v50 = vpack.c.bf16 %v1592_v17, %v4397_v61  ;;  %v3533_v51 = vpack.c.bf16 %v1563_v54, %v1551_v12  ;;  %v3535_v53 = vpack.c.bf16 %v1569_v56, %v1557_v55  ;;  %v3537_v57 = vpack.c.bf16 %v1587_v23, %v1575_v21 }
 0x422   : > { %1543 = vmatmul.mubr.f32.vlgmr.msra.gmra.mrb[6].mxu1 %v1542_v18  ;;  %v1589_v34 = vand.u32 4294901760, %v1588_v28  ;;  %v1595_v38 = vand.u32 4294901760, %v1594_v30  ;;  %v3539_v58 = vpack.c.bf16 %v1593_v26, %v1581_v24  ;;  %v2020_v43 = vrot.slane %v2019_v40, 4 }
 0x423   : > { %3512 = vmatpush1.bf16.msra.mxu1 %v3511_v31  ;;  %1653 = vmatprep.mubr.f32.mxu1 %v4991_v25  ;;  %v4988_v8 = vlaneseq }
 0x424   : > { %v3513_v2 = vpack.c.bf16 %v1589_v34, %v1577_v32  ;;  %v3515_v41 = vpack.c.bf16 %v1595_v38, %v1583_v35 }
 0x425   : > { %v4471_v5 = vand.u32 127, %v4988_v8 }
 0x426   : > { %3514 = vmatprep.subr.bf16.mxu1 %v3513_v2 }
 0x427   : > { %3516 = vmatpush1.bf16.msra.mxu1 %v3515_v41  ;;  %vm2042_vm6 = vcmp.lt.s32.totalorder %v4471_v5, 32  ;;  %vm2049_vm7 = vcmp.lt.s32.totalorder %v4471_v5, 16  ;;  %vm2063_vm8 = vcmp.lt.s32.totalorder %v4471_v5, 96  ;;  %vm2070_vm9 = vcmp.lt.s32.totalorder %v4471_v5, 80 }
 0x428   : > { %3518 = vmatprep.subr.bf16.mxu1 %v3517_v6  ;;  %vm2035_vm10 = vcmp.lt.s32.totalorder %v4471_v5, 48  ;;  %vm2056_vm13 = vcmp.lt.s32.totalorder %v4471_v5, 112  ;;  %vm2125_vm14 = vcmp.lt.s32.totalorder %v4471_v5, 3  ;;  %vm2150_vm15 = vcmp.lt.s32.totalorder %v4471_v5, 2 }
 0x429   : > { %vm2175_vm0 = vcmp.lt.s32.totalorder %v4471_v5, 1  ;;  %vm2237_vm3 = vcmp.lt.s32.totalorder %v4471_v5, 126 }
 0x42a   : > { %3279 = vmatmul.mubr.msk.f32.vlgmr.msra.gmra.mrb[6].mxu1 %vm304_vm2, %v4016_v45 }
 0x42b   : > { %3520 = vmatpush1.bf16.msra.mxu1 %v3519_v1  ;;  %1741 = vmatprep.mubr.f32.mxu1 %v4991_v25 }
 0x42c   : > { %3522 = vmatprep.subr.bf16.mxu1 %v3521_v52 }
 0x42f   : > { %3524 = vmatpush1.bf16.msra.mxu1 %v3523_v50 }
 0x430   : > { %3526 = vmatprep.subr.bf16.mxu1 %v4368_v46 }
 0x432   : > { %1744 = vmatmul.mubr.f32.vlgmr.msra.gmra.mrb[6].mxu1 %v4341_v37  ;;  %v2011_v37 = vrot.slane %v2010_v39, 4 }
 0x433   : > { %3528 = vmatpush1.bf16.msra.mxu1 %v4373_v48  ;;  %1822 = vmatprep.mubr.f32.mxu1 %v4991_v25 }
 0x434   : > { %3530 = vmatprep.subr.bf16.mxu1 %v4413_v14  ;;  %v2012_v0 = vmax.f32 %v2010_v39, %v2011_v37  ;;  %v2193_v39 = vld [vmem:[#allocation6 + $0x68] sm:$0xff] }
 0x436   : > { %v2013_v47 = vrot.slane %v2012_v0, 2 }
 0x437   : > { %3532 = vmatpush1.bf16.msra.mxu1 %v3507_v16 }
 0x438   : > { %3534 = vmatprep.subr.bf16.mxu1 %v3533_v51 }
 0x43a   : > { %1826 = vmatmul.mubr.f32.vlgmr.msra.gmra.mrb[6].mxu1 %v1540_v44  ;;  %v2021_v44 = vmax.f32 %v2019_v40, %v2020_v43  ;;  %v2192_v40 = vld [vmem:[#allocation6 + $0x60] sm:$0xff] }
 0x43b   : > { %3536 = vmatpush1.bf16.msra.mxu1 %v3535_v53  ;;  %1920 = vmatprep.mubr.f32.mxu1 %v4991_v25 }
 0x43c   : > { %3538 = vmatprep.subr.bf16.mxu1 %v3537_v57  ;;  %v2022_v49 = vrot.slane %v2021_v44, 2 }
 0x43e   : > { %v2023_v12 = vmax.f32 %v2021_v44, %v2022_v49  ;;  %v2195_v49 = vld [vmem:[#allocation6 + $0x78] sm:$0xff] }
 0x43f   : > { %3540 = vmatpush1.bf16.msra.mxu1 %v3539_v58 }
 0x440   : > { %3542 = vmatprep.subr.bf16.mxu1 %v4368_v46  ;;  %v2014_v46 = vmax.f32 %v2012_v0, %v2013_v47  ;;  %v2024_v55 = vrot.slane %v2023_v12, 1 }
 0x442   : > { %3280 = vmatmul.mubr.msk.f32.vlgmr.msra.gmra.mrb[6].mxu1 %vm304_vm2, %v4016_v45  ;;  %v2015_v54 = vrot.slane %v2014_v46, 1  ;;  %v2025_v59 = vmax.f32 %v2023_v12, %v2024_v55 }
 0x443   : > { %3544 = vmatpush1.bf16.msra.mxu1 %v4373_v48  ;;  %2000 = vmatprep.mubr.f32.mxu1 %v4991_v25 }
 0x444   : > { %3546 = vmatprep.subr.bf16.mxu1 %v4413_v14  ;;  %v2016_v48 = vmax.f32 %v2014_v46, %v2015_v54  ;;  %v2194_v46 = vld [vmem:[#allocation6 + $0x70] sm:$0xff] }
 0x447   : > { %3548 = vmatpush1.bf16.msra.mxu1 %v3507_v16 }
 0x44a   : > { %3281 = vmatmul.mubr.msk.f32.vlgmr.msra.gmra.mrb[6].mxu1 %vm304_vm2, %v4016_v45  ;;  %vm2212_vm2 = vcmp.lt.s32.totalorder %v4471_v5, 127 }
 0x44b   : > { %2404 = vmatprep.mubr.f32.mxu1 %v4991_v25 }
 0x51d   : > { %v2003_v56 = vpop.f32.mrb[6].mxu1 }
 0x51e   : > { %v4452_v60 = vsel %vm2026_vm5, %v2003_v56, %v2016_v48  ;;  %v2005_v61 = vpop.f32.mrb[7].mxu1 }
 0x51f   : > { %v4454_v62 = vsel %vm2026_vm5, %v2005_v61, %v2025_v59  ;;  %2038 = vrot.lane.b32.xlu1 %v4452_v60, %s4017_s10  ;;  %v2087_v19 = vrot.slane %v4452_v60, 2 }
 0x520   : > { %2040 = vrot.lane.b32.xlu0 %v4454_v62, %s4017_s10  ;;  %v2088_v34 = vrot.slane %v4454_v62, 2  ;;  %s3290_s10 = sshll.u32 %s4081_s22, 10 }
 0x523   : > { %2059 = vrot.lane.b32.xlu1 %v4452_v60, %s4018_s12 }
 0x524   : > { %2061 = vrot.lane.b32.xlu0 %v4454_v62, %s4018_s12  ;;  %s257_s12 = scalar_lea.vmem [#allocation8], %s3272_s11  ;;  %s4932_s11 = scalar_lea.hbm %s4984_s5, %s3290_s10 }
 0x527   : > { %2045 = vrot.lane.b32.xlu1 %v4452_v60, %s4019_s24 }
 0x528   : > { %2047 = vrot.lane.b32.xlu0 %v4454_v62, %s4019_s24 }
 0x52b   : > { %2066 = vrot.lane.b32.xlu1 %v4452_v60, %s4020_s26 }
 0x52c   : > { %2068 = vrot.lane.b32.xlu0 %v4454_v62, %s4020_s26  ;;  %s3181_s26 = sshll.u32 %s257_s12, 4  ;;  %s4934_s26 = int_to_ptr.vmem [resolvable:$true] %s3181_s26 }
 0x52f   : > { %2029 = vrot.lane.b32.xlu1 %v4452_v60, %s4021_s16 }
 0x530   : > { %2031 = vrot.lane.b32.xlu0 %v4454_v62, %s4021_s16 }
 0x533   : > { %2052 = vrot.lane.b32.xlu1 %v4452_v60, %s4022_s17 }
 0x534   : > { %2054 = vrot.lane.b32.xlu0 %v4454_v62, %s4022_s17  ;;  %s3935_s17 = scalar_lea.vmem %s4934_s26, 1024 }
 0x535   : > { %p3936_p4 = scmp.ne.s32.totalorder %s4934_s26, %s3935_s17 }
 0x537   : > { %p3937_p6 = pnand %p3936_p4, %p4154_p12 }
 0x539   : > { %p3938_p8 = pneg %p3937_p6 }
 0x591   : > { %v2039_v63 = vpop.permute.xlu1 %2038 }
 0x592   : > { %v2041_v3 = vpop.permute.xlu0 %2040 }
 0x593   : > { %v2043_v14 = vsel %vm2042_vm6, %v2039_v63, %v2041_v3  ;;  %v2044_v15 = vsel %vm2042_vm6, %v2041_v3, %v2039_v63 }
 0x594   : > { %v2075_v20 = vrot.slane %v2044_v15, 6  ;;  %v2076_v21 = vrot.slane %v2043_v14, 6 }
 0x595   : > { %v2060_v4 = vpop.permute.xlu1 %2059 }
 0x596   : > { %v2062_v9 = vpop.permute.xlu0 %2061 }
 0x597   : > { %v2064_v23 = vsel %vm2063_vm8, %v2060_v4, %v2062_v9  ;;  %v2065_v24 = vsel %vm2063_vm8, %v2062_v9, %v2060_v4 }
 0x598   : > { %v2093_v2 = vrot.slane %v2064_v23, 6  ;;  %v2094_v41 = vrot.slane %v2065_v24, 6 }
 0x599   : > { %v2046_v7 = vpop.permute.xlu1 %2045 }
 0x59a   : > { %v2048_v10 = vpop.permute.xlu0 %2047 }
 0x59b   : > { %v2050_v17 = vsel %vm2049_vm7, %v2046_v7, %v2048_v10  ;;  %v2051_v18 = vsel %vm2049_vm7, %v2048_v10, %v2046_v7 }
 0x59c   : > { %v2081_v26 = vrot.slane %v2051_v18, 4  ;;  %v2082_v27 = vrot.slane %v2050_v17, 4 }
 0x59d   : > { %v2067_v13 = vpop.permute.xlu1 %2066 }
 0x59e   : > { %v2069_v16 = vpop.permute.xlu0 %2068 }
 0x59f   : > { %v2071_v29 = vsel %vm2070_vm9, %v2067_v13, %v2069_v16  ;;  %v2072_v30 = vsel %vm2070_vm9, %v2069_v16, %v2067_v13 }
 0x5a0   : > { %v2099_v52 = vrot.slane %v2071_v29, 4  ;;  %v2100_v50 = vrot.slane %v2072_v30, 4 }
 0x5a1   : > { %v2030_v22 = vpop.permute.xlu1 %2029 }
 0x5a2   : > { %v2032_v28 = vpop.permute.xlu0 %2031 }
 0x5a3   : > { %v2036_v31 = vsel %vm2035_vm10, %v2030_v22, %v2032_v28  ;;  %v2037_v32 = vsel %vm2035_vm10, %v2032_v28, %v2030_v22 }
 0x5a4   : > { %v2103_v35 = vsel %vm811_vm4, %v2037_v32, %v2075_v20  ;;  %v2104_v38 = vsel %vm811_vm4, %v2036_v31, %v2076_v21 }
 0x5a5   : > { %v2106_v6 = vsel %vm2105_vm11, %v2103_v35, %v2081_v26  ;;  %v2107_v1 = vsel %vm2105_vm11, %v2104_v38, %v2082_v27  ;;  %v2053_v45 = vpop.permute.xlu1 %2052  ;;  %v2130_v35 = vld [vmem:[#allocation6] sm:$0xff]  ;;  %v2131_v38 = vld [vmem:[#allocation6 + $0x8] sm:$0xff] }
 0x5a6   : > { %v4486_v51 = vsel %vm2108_vm12, %v2106_v6, %v2087_v19  ;;  %v4489_v53 = vsel %vm2108_vm12, %v2107_v1, %v2088_v34  ;;  %v2055_v57 = vpop.permute.xlu0 %2054 }
 0x5a7   : > { %v2057_v58 = vsel %vm2056_vm13, %v2053_v45, %v2055_v57  ;;  %v2058_v37 = vsel %vm2056_vm13, %v2055_v57, %v2053_v45  ;;  %2117 = vrot.lane.b32.xlu1 %v4486_v51, %s4023_s14  ;;  %v2197_v43 = vmul.f32 %v2193_v39, %v4489_v53  ;;  %v2196_v0 = vmul.f32 %v2192_v40, %v4486_v51  ;;  %v2132_v45 = vld [vmem:[#allocation6 + $0x10] sm:$0xff] }
 0x5a8   : > { %v2111_v44 = vsel %vm811_vm4, %v2057_v58, %v2093_v2  ;;  %v2112_v47 = vsel %vm811_vm4, %v2058_v37, %v2094_v41  ;;  %vm2262_vm4 = vcmp.lt.s32.totalorder %v4471_v5, 125 }
 0x5a9   : > { %v2113_v12 = vsel %vm2105_vm11, %v2111_v44, %v2099_v52  ;;  %v2114_v54 = vsel %vm2105_vm11, %v2112_v47, %v2100_v50  ;;  %v2336_v55 = vand.u32 4294901760, %v2197_v43  ;;  %v2338_v48 = vand.u32 4294901760, %v2196_v0  ;;  %v2133_v52 = vld [vmem:[#allocation6 + $0x18] sm:$0xff] }
 0x5aa   : > { %v2115_v56 = vsel %vm2108_vm12, %v2113_v12, 0.0  ;;  %v2116_v59 = vsel %vm2108_vm12, %v2114_v54, 0.0  ;;  %v2156_v12 = vld [vmem:[#allocation6 + $0x28] sm:$0xff] }
 0x5ab   : > { %2119 = vrot.lane.b32.xlu0 %v2115_v56, %s4023_s14  ;;  %2121 = vrot.lane.b32.xlu1 %v4489_v53, %s4023_s14  ;;  %v2199_v60 = vmul.f32 %v2195_v49, %v2116_v59  ;;  %v4501_v61 = vsub.f32 %v2197_v43, %v2336_v55  ;;  %v2198_v62 = vmul.f32 %v2194_v46, %v2115_v56  ;;  %v2155_v46 = vld [vmem:[#allocation6 + $0x20] sm:$0xff] }
 0x5ac   : > { %v4503_v63 = vsub.f32 %v2196_v0, %v2338_v48 }
 0x5ad   : > { %v2340_v3 = vand.u32 4294901760, %v2199_v60  ;;  %v2342_v4 = vand.u32 4294901760, %v2198_v62  ;;  %v2490_v9 = vand.u32 4294901760, %v4501_v61 }
 0x5ae   : > { %v2496_v7 = vand.u32 4294901760, %v4503_v63 }
 0x5af   : > { %2123 = vrot.lane.b32.xlu0 %v2116_v59, %s4023_s14  ;;  %2142 = vrot.lane.b32.xlu1 %v4486_v51, %s4024_s6  ;;  %v4508_v10 = vpack.c.bf16 %v2340_v3, %v2336_v55  ;;  %v4510_v13 = vsub.f32 %v2199_v60, %v2340_v3  ;;  %v4512_v14 = vpack.c.bf16 %v2342_v4, %v2338_v48  ;;  %s4028_s14 = smov [#allocation8]  }
 0x5b0   : > { %v4514_v15 = vsub.f32 %v2198_v62, %v2342_v4  ;;  %v2491_v17 = vsub.f32 %v4501_v61, %v2490_v9  ;;  %v2497_v20 = vsub.f32 %v4503_v63, %v2496_v7 }
 0x5b1   : > { %v3617_v16 = vpack.c.bf16 %v4510_v13, %v4501_v61  ;;  %v2502_v18 = vand.u32 4294901760, %v4510_v13 }
 0x5b2   : > { %v3619_v19 = vpack.c.bf16 %v4514_v15, %v4503_v63  ;;  %v2508_v21 = vand.u32 4294901760, %v4514_v15  ;;  %v2492_v27 = vand.u32 4294901760, %v2491_v17  ;;  %v2498_v29 = vand.u32 4294901760, %v2497_v20  ;;  %v2158_v17 = vld [vmem:[#allocation6 + $0x38] sm:$0xff] }
 0x5b3   : > { %2144 = vrot.lane.b32.xlu0 %v2115_v56, %s4024_s6  ;;  %2146 = vrot.lane.b32.xlu1 %v4489_v53, %s4024_s6  ;;  %v2503_v22 = vsub.f32 %v4510_v13, %v2502_v18  ;;  %v4526_v23 = vpack.c.bf16 %v2502_v18, %v2490_v9  ;;  %v2244_v13 = vld [vmem:[#allocation6 + $0xb0] sm:$0xff] }
 0x5b4   : > { %v2509_v24 = vsub.f32 %v4514_v15, %v2508_v21  ;;  %v4529_v26 = vpack.c.bf16 %v2508_v21, %v2496_v7  ;;  %v2157_v7 = vld [vmem:[#allocation6 + $0x30] sm:$0xff] }
 0x5b5   : > { %v2504_v28 = vand.u32 4294901760, %v2503_v22 }
 0x5b6   : > { %5029 = vst [vmem:[#allocation16_spill] sm:$0xff] %v4529_v26  ;;  %v2510_v30 = vand.u32 4294901760, %v2509_v24 }
 0x5b7   : > { %2148 = vrot.lane.b32.xlu0 %v2116_v59, %s4024_s6  ;;  %2167 = vrot.lane.b32.xlu1 %v4486_v51, %s4025_s15  ;;  %v4532_v31 = vpack.c.bf16 %v2504_v28, %v2492_v27  ;;  %s3939_s6 = sshll.u32 %s4028_s14, 4  ;;  %s3940_s6 = int_to_ptr.vmem [resolvable:$false] %s3939_s6 }
 0x5b8   : > { %v4534_v32 = vpack.c.bf16 %v2510_v30, %v2498_v29  ;;  %p3942_p10 = scmp.lt.s32.totalorder %s4934_s26, %s3940_s6 }
 0x5bb   : > { %2169 = vrot.lane.b32.xlu0 %v2115_v56, %s4025_s15  ;;  %2171 = vrot.lane.b32.xlu1 %v4489_v53, %s4025_s15 }
 0x5bf   : > { %2173 = vrot.lane.b32.xlu0 %v2116_v59, %s4025_s15  ;;  %2204 = vrot.lane.b32.xlu1 %v4486_v51, %s4014_s27  ;;  %s3941_s15 = scalar_lea.vmem %s3940_s6, 2048 }
 0x5c0   : > { %p3943_p13 = scmp.lt.s32.totalorder %s3941_s15, %s3935_s17 }
 0x5c2   : > { %p3944_p3 = por %p3943_p13, %p3942_p10 }
 0x5c3   : > { %2206 = vrot.lane.b32.xlu0 %v2115_v56, %s4014_s27  ;;  %2208 = vrot.lane.b32.xlu1 %v4489_v53, %s4014_s27 }
 0x5c4   : > { %p3945_p7 = pnand %p3944_p3, %p3938_p8 }
 0x5c7   : > { %2210 = vrot.lane.b32.xlu0 %v2116_v59, %s4014_s27  ;;  %2229 = vrot.lane.b32.xlu1 %v4486_v51, %s4026_s13 }
 0x5cb   : > { %2231 = vrot.lane.b32.xlu0 %v2115_v56, %s4026_s13  ;;  %2233 = vrot.lane.b32.xlu1 %v4489_v53, %s4026_s13 }
 0x5cf   : > { %2235 = vrot.lane.b32.xlu0 %v2116_v59, %s4026_s13  ;;  %2254 = vrot.lane.b32.xlu1 %v4486_v51, %s4027_s29 }
 0x5d3   : > { %2256 = vrot.lane.b32.xlu0 %v2115_v56, %s4027_s29  ;;  %2258 = vrot.lane.b32.xlu1 %v4489_v53, %s4027_s29 }
 0x5d7   : > { %2260 = vrot.lane.b32.xlu0 %v2116_v59, %s4027_s29 }
 0x619   : > { %v2118_v34 = vpop.permute.xlu1 %2117 }
 0x61d   : > { %v2120_v39 = vpop.permute.xlu0 %2119  ;;  %v2122_v40 = vpop.permute.xlu1 %2121 }
 0x61e   : > { %v2126_v2 = vsel %vm2125_vm14, %v2118_v34, %v2122_v40  ;;  %v2128_v41 = vsel %vm2125_vm14, %v2122_v40, %v2118_v34 }
 0x61f   : > { %v2134_v6 = vmul.f32 %v2130_v35, %v2128_v41  ;;  %v2135_v1 = vmul.f32 %v2131_v38, %v2126_v2  ;;  %v2180_v38 = vld [vmem:[#allocation6 + $0x40] sm:$0xff]  ;;  %v2181_v41 = vld [vmem:[#allocation6 + $0x48] sm:$0xff] }
 0x621   : > { %v2124_v50 = vpop.permute.xlu0 %2123  ;;  %v2143_v57 = vpop.permute.xlu1 %2142  ;;  %v2312_v51 = vand.u32 4294901760, %v2135_v1  ;;  %v2314_v53 = vand.u32 4294901760, %v2134_v6 }
 0x622   : > { %v2127_v58 = vsel %vm2125_vm14, %v2120_v39, %v2124_v50  ;;  %v2129_v37 = vsel %vm2125_vm14, %v2124_v50, %v2120_v39 }
 0x623   : > { %v2136_v43 = vmul.f32 %v2132_v45, %v2129_v37  ;;  %v2137_v0 = vmul.f32 %v2133_v52, %v2127_v58  ;;  %v4549_v55 = vsub.f32 %v2135_v1, %v2312_v51  ;;  %v4555_v59 = vsub.f32 %v2134_v6, %v2314_v53 }
 0x625   : > { %v2316_v44 = vand.u32 4294901760, %v2137_v0  ;;  %v2318_v47 = vand.u32 4294901760, %v2136_v43  ;;  %v2145_v49 = vpop.permute.xlu0 %2144  ;;  %v2147_v54 = vpop.permute.xlu1 %2146 }
 0x626   : > { %v2151_v48 = vsel %vm2150_vm15, %v2143_v57, %v2147_v54  ;;  %v2153_v56 = vsel %vm2150_vm15, %v2147_v54, %v2143_v57 }
 0x627   : > { %v4557_v60 = vpack.c.bf16 %v2318_v47, %v2314_v53  ;;  %v4559_v62 = vsub.f32 %v2137_v0, %v2316_v44  ;;  %v4561_v3 = vsub.f32 %v2136_v43, %v2318_v47  ;;  %v2159_v4 = vmul.f32 %v2155_v46, %v2153_v56  ;;  %v2182_v43 = vld [vmem:[#allocation6 + $0x50] sm:$0xff]  ;;  %v2183_v0 = vld [vmem:[#allocation6 + $0x58] sm:$0xff] }
 0x628   : > { %v2160_v9 = vmul.f32 %v2156_v12, %v2151_v48  ;;  %v4563_v18 = vpack.c.bf16 %v2316_v44, %v2312_v51 }
 0x629   : > { %v2149_v20 = vpop.permute.xlu0 %2148  ;;  %v2168_v21 = vpop.permute.xlu1 %2167  ;;  %v3605_v22 = vpack.c.bf16 %v4559_v62, %v4549_v55  ;;  %v3607_v24 = vpack.c.bf16 %v4561_v3, %v4555_v59  ;;  %v2322_v28 = vand.u32 4294901760, %v2159_v4  ;;  %v5030_v11 = vand.u32 4294901760, %v4559_v62 }
 0x62a   : > { %v2320_v27 = vand.u32 4294901760, %v2160_v9  ;;  %v2152_v29 = vsel %vm2150_vm15, %v2145_v49, %v2149_v20  ;;  %v2154_v30 = vsel %vm2150_vm15, %v2149_v20, %v2145_v49  ;;  %3550 = vmatprep.subr.bf16.mxu1 %v4563_v18 }
 0x62b   : > { %v2161_v34 = vmul.f32 %v2157_v7, %v2154_v30  ;;  %v2162_v35 = vmul.f32 %v2158_v17, %v2152_v29  ;;  %3552 = vmatpush1.bf16.msra.mxu1 %v4557_v60  ;;  %3606 = vmatprep.subr.bf16.mxu0 %v3605_v22  ;;  %v4578_v45 = vsub.f32 %v2159_v4, %v2322_v28  ;;  %v2279_v4 = vld [vmem:[%s4982_s3] sm:$0x1] }
 0x62c   : > { %3608 = vmatpush1.bf16.msra.mxu0 %v3607_v24  ;;  %v4576_v1 = vsub.f32 %v2160_v9, %v2320_v27  ;;  %v2217_v24 = vld [vmem:[#allocation6 + $0x80] sm:$0xff]  ;;  %v2310_v29 = vsel %vm2308_vm1, %v2279_v4, 0  ;;  %v2431_v42 = vsub.f32 %v4559_v62, %v5030_v11  ;;  %v5031_v11 = vand.u32 4294901760, %v4561_v3 }
 0x62d   : > { %v2324_v39 = vand.u32 4294901760, %v2162_v35  ;;  %v2326_v40 = vand.u32 4294901760, %v2161_v34  ;;  %v2170_v2 = vpop.permute.xlu0 %2169  ;;  %v2172_v6 = vpop.permute.xlu1 %2171 }
 0x62e   : > { %v2176_v52 = vsel %vm2175_vm0, %v2168_v21, %v2172_v6  ;;  %v2178_v50 = vsel %vm2175_vm0, %v2172_v6, %v2168_v21 }
 0x62f   : > { %v4584_v57 = vpack.c.bf16 %v2326_v40, %v2322_v28  ;;  %v4586_v51 = vsub.f32 %v2162_v35, %v2324_v39  ;;  %v4588_v58 = vsub.f32 %v2161_v34, %v2326_v40  ;;  %v2184_v37 = vmul.f32 %v2180_v38, %v2178_v50  ;;  %v2220_v50 = vld [vmem:[#allocation6 + $0x98] sm:$0xff] }
 0x630   : > { %v2185_v53 = vmul.f32 %v2181_v41, %v2176_v52  ;;  %v4590_v44 = vpack.c.bf16 %v2324_v39, %v2320_v27  ;;  %v2218_v27 = vld [vmem:[#allocation6 + $0x88] sm:$0xff]  ;;  %v2219_v52 = vld [vmem:[#allocation6 + $0x90] sm:$0xff] }
 0x631   : > { %v2174_v47 = vpop.permute.xlu0 %2173  ;;  %v2205_v49 = vpop.permute.xlu1 %2204  ;;  %v3609_v46 = vpack.c.bf16 %v4586_v51, %v4576_v1  ;;  %v3611_v12 = vpack.c.bf16 %v4588_v58, %v4578_v45  ;;  %v2330_v54 = vand.u32 4294901760, %v2184_v37  ;;  %v5032_v33 = vand.u32 4294901760, %v4586_v51 }
 0x632   : > { %v2177_v48 = vsel %vm2175_vm0, %v2170_v2, %v2174_v47  ;;  %v2179_v56 = vsel %vm2175_vm0, %v2174_v47, %v2170_v2  ;;  %3554 = vmatprep.subr.bf16.mxu1 %v4590_v44  ;;  %v2328_v9 = vand.u32 4294901760, %v2185_v53 }
 0x633   : > { %v2186_v7 = vmul.f32 %v2182_v43, %v2179_v56  ;;  %v2187_v17 = vmul.f32 %v2183_v0, %v2177_v48  ;;  %3556 = vmatpush1.bf16.msra.mxu1 %v4584_v57  ;;  %3610 = vmatprep.subr.bf16.mxu0 %v3609_v46  ;;  %v4606_v30 = vsub.f32 %v2184_v37, %v2330_v54  ;;  %v4622_v43 = vand.u32 4294901760, %v2310_v29 }
 0x634   : > { %3612 = vmatpush1.bf16.msra.mxu0 %v3611_v12  ;;  %v4612_v38 = vsub.f32 %v2185_v53, %v2328_v9 }
 0x635   : > { %v2332_v20 = vand.u32 4294901760, %v2187_v17  ;;  %v2334_v21 = vand.u32 4294901760, %v2186_v7  ;;  %v2207_v22 = vpop.permute.xlu0 %2206  ;;  %v2209_v28 = vpop.permute.xlu1 %2208 }
 0x636   : > { %v2213_v34 = vsel %vm2212_vm2, %v2205_v49, %v2209_v28  ;;  %v2215_v35 = vsel %vm2212_vm2, %v2209_v28, %v2205_v49 }
 0x637   : > { %v4614_v39 = vpack.c.bf16 %v2334_v21, %v2330_v54  ;;  %v4616_v40 = vsub.f32 %v2187_v17, %v2332_v20  ;;  %v4618_v2 = vsub.f32 %v2186_v7, %v2334_v21  ;;  %v2221_v41 = vmul.f32 %v2217_v24, %v2213_v34 }
 0x638   : > { %v2222_v6 = vmul.f32 %v2218_v27, %v2215_v35  ;;  %v4620_v37 = vpack.c.bf16 %v2332_v20, %v2328_v9  ;;  %v2242_v9 = vld [vmem:[#allocation6 + $0xa0] sm:$0xff]  ;;  %v4637_v7 = vsub.f32 %v2310_v29, %v4622_v43 }
 0x639   : > { %v2211_v0 = vpop.permute.xlu0 %2210  ;;  %v2230_v47 = vpop.permute.xlu1 %2229  ;;  %v3613_v53 = vpack.c.bf16 %v4616_v40, %v4612_v38  ;;  %v3615_v49 = vpack.c.bf16 %v4618_v2, %v4606_v30  ;;  %v2346_v12 = vand.u32 4294901760, %v2221_v41 }
 0x63a   : > { %v2344_v46 = vand.u32 4294901760, %v2222_v6  ;;  %v2214_v54 = vsel %vm2212_vm2, %v2207_v22, %v2211_v0  ;;  %v2216_v48 = vsel %vm2212_vm2, %v2211_v0, %v2207_v22  ;;  %3558 = vmatprep.subr.bf16.mxu1 %v4620_v37  ;;  %v2243_v22 = vld [vmem:[#allocation6 + $0xa8] sm:$0xff] }
 0x63b   : > { %v2223_v56 = vmul.f32 %v2219_v52, %v2214_v54  ;;  %v2224_v4 = vmul.f32 %v2220_v50, %v2216_v48  ;;  %3560 = vmatpush1.bf16.msra.mxu1 %v4614_v39  ;;  %3614 = vmatprep.subr.bf16.mxu0 %v3613_v53  ;;  %v4644_v28 = vsub.f32 %v2221_v41, %v2346_v12  ;;  %v4993_v48 = vand.u32 4294901760, %v4549_v55 }
 0x63c   : > { %3562 = vmatprep.subr.bf16.mxu1 %v4508_v10  ;;  %3616 = vmatpush1.bf16.msra.mxu0 %v3615_v49  ;;  %v4642_v27 = vsub.f32 %v2222_v6, %v2344_v46  ;;  %v4989_v6 = vand.u32 4294901760, %v4637_v7 }
 0x63d   : > { %v2348_v17 = vand.u32 4294901760, %v2224_v4  ;;  %v2350_v20 = vand.u32 4294901760, %v2223_v56  ;;  %v2232_v21 = vpop.permute.xlu0 %2231  ;;  %v2234_v24 = vpop.permute.xlu1 %2233  ;;  %3618 = vmatprep.subr.bf16.mxu0 %v3617_v16  ;;  %v2245_v16 = vld [vmem:[#allocation6 + $0xb8] sm:$0xff] }
 0x63e   : > { %v2238_v34 = vsel %vm2237_vm3, %v2230_v47, %v2234_v24  ;;  %v2240_v29 = vsel %vm2237_vm3, %v2234_v24, %v2230_v47  ;;  %v4990_v47 = vand.u32 4294901760, %v4555_v59 }
 0x63f   : > { %v4650_v35 = vpack.c.bf16 %v2350_v20, %v2346_v12  ;;  %v4652_v52 = vsub.f32 %v2224_v4, %v2348_v17  ;;  %v4654_v50 = vsub.f32 %v2223_v56, %v2350_v20  ;;  %v2246_v0 = vmul.f32 %v2242_v9, %v2238_v34  ;;  %3564 = vmatpush1.bf16.msra.mxu1 %v4512_v14  ;;  %v2267_v34 = vld [vmem:[#allocation6 + $0xc0] sm:$0xff]  ;;  %v2269_v9 = vld [vmem:[#allocation6 + $0xd0] sm:$0xff] }
 0x640   : > { %v2247_v61 = vmul.f32 %v2243_v22, %v2240_v29  ;;  %3620 = vmatpush1.bf16.msra.mxu0 %v3619_v19  ;;  %v4660_v41 = vpack.c.bf16 %v2348_v17, %v2344_v46  ;;  %v4680_v17 = vsub.f32 %v4637_v7, %v4989_v6  ;;  %v4685_v20 = vsub.f32 %v4555_v59, %v4990_v47  ;;  %v2268_v29 = vld [vmem:[#allocation6 + $0xc8] sm:$0xff] }
 0x641   : > { %v2236_v53 = vpop.permute.xlu0 %2235  ;;  %v2255_v49 = vpop.permute.xlu1 %2254  ;;  %v3621_v12 = vpack.c.bf16 %v4652_v52, %v4642_v27  ;;  %v3623_v54 = vpack.c.bf16 %v4654_v50, %v4644_v28  ;;  %v2354_v63 = vand.u32 4294901760, %v2246_v0 }
 0x642   : > { %v2239_v15 = vsel %vm2237_vm3, %v2232_v21, %v2236_v53  ;;  %v2241_v19 = vsel %vm2237_vm3, %v2236_v53, %v2232_v21  ;;  %3566 = vmatprep.subr.bf16.mxu1 %v4660_v41  ;;  %v2352_v46 = vand.u32 4294901760, %v2247_v61  ;;  %v2270_v53 = vld [vmem:[#allocation6 + $0xd8] sm:$0xff] }
 0x643   : > { %v2248_v56 = vmul.f32 %v2244_v13, %v2239_v15  ;;  %v2249_v4 = vmul.f32 %v2245_v16, %v2241_v19  ;;  %3568 = vmatpush1.bf16.msra.mxu1 %v4650_v35  ;;  %3622 = vmatprep.subr.bf16.mxu0 %v3621_v12  ;;  %v2419_v16 = vsub.f32 %v4549_v55, %v4993_v48 }
 0x644   : > { %3624 = vmatpush1.bf16.msra.mxu0 %v3623_v54  ;;  %v4691_v12 = vsub.f32 %v2246_v0, %v2354_v63  ;;  %v4697_v8 = vsub.f32 %v2247_v61, %v2352_v46 }
 0x645   : > { %v2356_v21 = vand.u32 4294901760, %v2249_v4  ;;  %v2358_v22 = vand.u32 4294901760, %v2248_v56  ;;  %v2257_v24 = vpop.permute.xlu0 %2256  ;;  %v2259_v13 = vpop.permute.xlu1 %2258  ;;  %v2420_v5 = vand.u32 4294901760, %v2419_v16 }
 0x646   : > { %v2263_v15 = vsel %vm2262_vm4, %v2255_v49, %v2259_v13  ;;  %v2265_v19 = vsel %vm2262_vm4, %v2259_v13, %v2255_v49 }
 0x647   : > { %v4699_v54 = vpack.c.bf16 %v2358_v22, %v2354_v63  ;;  %v4701_v6 = vsub.f32 %v2249_v4, %v2356_v21  ;;  %v4703_v47 = vsub.f32 %v2248_v56, %v2358_v22  ;;  %v2271_v25 = vmul.f32 %v2267_v34, %v2263_v15 }
 0x648   : > { %v2272_v48 = vmul.f32 %v2268_v29, %v2265_v19  ;;  %v4705_v0 = vpack.c.bf16 %v2356_v21, %v2352_v46  ;;  %v2437_v34 = vsub.f32 %v4561_v3, %v5031_v11  ;;  %v2409_v15 = vand.u32 4294901760, %v4680_v17 }
 0x649   : > { %v2261_v36 = vpop.permute.xlu0 %2260  ;;  %v3625_v61 = vpack.c.bf16 %v4701_v6, %v4697_v8  ;;  %v3627_v49 = vpack.c.bf16 %v4703_v47, %v4691_v12  ;;  %v2362_v22 = vand.u32 4294901760, %v2271_v25  ;;  %v5002_v63 = vand.u32 4294901760, %v4588_v58 }
 0x64a   : > { %v2360_v4 = vand.u32 4294901760, %v2272_v48  ;;  %v2264_v46 = vsel %vm2262_vm4, %v2257_v24, %v2261_v36  ;;  %v2266_v21 = vsel %vm2262_vm4, %v2261_v36, %v2257_v24  ;;  %3570 = vmatprep.subr.bf16.mxu1 %v4705_v0  ;;  %v2432_v36 = vand.u32 4294901760, %v2431_v42 }
 0x64b   : > { %v2273_v29 = vmul.f32 %v2269_v9, %v2264_v46  ;;  %v2274_v13 = vmul.f32 %v2270_v53, %v2266_v21  ;;  %3572 = vmatpush1.bf16.msra.mxu1 %v4699_v54  ;;  %3626 = vmatprep.subr.bf16.mxu0 %v3625_v61  ;;  %v2455_v11 = vsub.f32 %v4586_v51, %v5032_v33  ;;  %v5033_v17 = vand.u32 4294901760, %v4576_v1 }
 0x64c   : > { %3628 = vmatpush1.bf16.msra.mxu0 %v3627_v49  ;;  %v4732_v53 = vsub.f32 %v2272_v48, %v2360_v4  ;;  %v4734_v61 = vsub.f32 %v2271_v25, %v2362_v22  ;;  %v5003_v49 = vand.u32 4294901760, %v4612_v38  ;;  %v2461_v33 = vsub.f32 %v4588_v58, %v5002_v63 }
 0x64d   : > { %v2364_v24 = vand.u32 4294901760, %v2274_v13  ;;  %v2366_v56 = vand.u32 4294901760, %v2273_v29  ;;  %v2443_v46 = vsub.f32 %v4576_v1, %v5033_v17  ;;  %v2484_v25 = vand.u32 4294901760, %v4618_v2 }
 0x64e   : > { %v3577_v48 = vpack.c.bf16 %v2432_v36, %v2420_v5  ;;  %v2438_v9 = vand.u32 4294901760, %v2437_v34  ;;  %v2426_v34 = vand.u32 4294901760, %v4685_v20  ;;  %v5009_v20 = vand.u32 4294901760, %v4652_v52 }
 0x64f   : > { %v4740_v16 = vpack.c.bf16 %v2366_v56, %v2362_v22  ;;  %v4742_v42 = vsub.f32 %v2274_v13, %v2364_v24  ;;  %v4744_v21 = vsub.f32 %v2273_v29, %v2366_v56  ;;  %v4746_v19 = vpack.c.bf16 %v2364_v24, %v2360_v4 }
 0x650   : > { %v2456_v56 = vand.u32 4294901760, %v2455_v11  ;;  %v5034_v4 = vand.u32 4294901760, %v4616_v40  ;;  %v5035_v24 = vand.u32 4294901760, %v4578_v45  ;;  %v2444_v36 = vand.u32 4294901760, %v2443_v46 }
 0x651   : > { %3574 = vmatprep.subr.bf16.mxu1 %v4746_v19  ;;  %v3629_v22 = vpack.c.bf16 %v4742_v42, %v4732_v53  ;;  %v3631_v13 = vpack.c.bf16 %v4744_v21, %v4734_v61  ;;  %v2467_v11 = vsub.f32 %v4612_v38, %v5003_v49  ;;  %v3579_v63 = vpack.c.bf16 %v2438_v9, %v2426_v34 }
 0x652   : > { %v2479_v29 = vsub.f32 %v4616_v40, %v5034_v4  ;;  %v2449_v17 = vsub.f32 %v4578_v45, %v5035_v24  ;;  %3576 = vmatpush1.bf16.msra.mxu1 %v4740_v16  ;;  %v2485_v4 = vsub.f32 %v4618_v2, %v2484_v25  ;;  %v2462_v24 = vand.u32 4294901760, %v2461_v33 }
 0x653   : > { %3578 = vmatprep.subr.bf16.mxu1 %v3577_v48  ;;  %3630 = vmatprep.subr.bf16.mxu0 %v3629_v22  ;;  %v3581_v5 = vpack.c.bf16 %v2456_v56, %v2444_v36  ;;  %v5036_v46 = vand.u32 4294901760, %v4606_v30  ;;  %v5037_v49 = vmov 0.0   ;;  %v2468_v9 = vand.u32 4294901760, %v2467_v11 }
 0x654   : > { %3632 = vmatpush1.bf16.msra.mxu0 %v3631_v13  ;;  %v2480_v26 = vand.u32 4294901760, %v2479_v29  ;;  %v2450_v22 = vand.u32 4294901760, %v2449_v17  ;;  %v2514_v33 = vand.u32 4294901760, %v4642_v27  ;;  %v2486_v56 = vand.u32 4294901760, %v2485_v4 }
 0x655   : > { %3634 = vmatprep.subr.bf16.mxu0 %v4563_v18  ;;  %2410 = vmatmul.mubr.f32.vlgmr.msra.gmra.mrb[8].mxu1 %v2409_v15  ;;  %v2473_v48 = vsub.f32 %v4606_v30, %v5036_v46  ;;  %v5005_v15 = vand.u32 4294901760, %v4654_v50  ;;  %v2527_v29 = vsub.f32 %v4652_v52, %v5009_v20  ;;  %v5004_v17 = vand.u32 4294901760, %v4701_v6 }
 0x656   : > { %3580 = vmatpush1.bf16.msra.mxu1 %v3579_v63  ;;  %2620 = vmatprep.mubr.f32.mxu1 %v5037_v49  ;;  %v3583_v13 = vpack.c.bf16 %v2462_v24, %v2450_v22  ;;  %v3585_v63 = vpack.c.bf16 %v2480_v26, %v2468_v9  ;;  %v2515_v36 = vsub.f32 %v4642_v27, %v2514_v33  ;;  %v5006_v11 = vand.u32 4294901760, %v4697_v8 }
 0x657   : > { %3582 = vmatprep.subr.bf16.mxu1 %v3581_v5  ;;  %2751 = vmatmul.mubr.f32.vlgmr.msra.gmra.mrb[2].mxu0 %v4637_v7  ;;  %v5007_v5 = vand.u32 4294901760, %v4644_v28  ;;  %v2474_v34 = vand.u32 4294901760, %v2473_v48  ;;  %v2533_v26 = vsub.f32 %v4654_v50, %v5005_v15  ;;  %v5008_v4 = vand.u32 4294901760, %v4703_v47 }
 0x658   : > { %3636 = vmatpush1.bf16.msra.mxu0 %v4557_v60  ;;  %2849 = vmatprep.mubr.f32.mxu0 %v5037_v49  ;;  %v2528_v46 = vand.u32 4294901760, %v2527_v29  ;;  %v2551_v48 = vsub.f32 %v4701_v6, %v5004_v17  ;;  %v5010_v22 = vand.u32 4294901760, %v4742_v42  ;;  %v5012_v29 = vand.u32 4294901760, %v4732_v53 }
 0x659   : > { %3638 = vmatprep.subr.bf16.mxu0 %v4590_v44  ;;  %v3587_v24 = vpack.c.bf16 %v2486_v56, %v2474_v34  ;;  %v2521_v9 = vsub.f32 %v4644_v28, %v5007_v5  ;;  %v2539_v56 = vsub.f32 %v4697_v8, %v5006_v11  ;;  %v2557_v34 = vsub.f32 %v4703_v47, %v5008_v4 }
 0x65a   : > { %3584 = vmatpush1.bf16.msra.mxu1 %v3583_v13  ;;  %v5011_v13 = vand.u32 4294901760, %v4691_v12  ;;  %v5013_v17 = vand.u32 4294901760, %v4744_v21  ;;  %v2534_v15 = vand.u32 4294901760, %v2533_v26  ;;  %v2568_v5 = vand.u32 4294901760, %v4734_v61 }
 0x65b   : > { %3586 = vmatprep.subr.bf16.mxu1 %v3585_v63  ;;  %v2516_v63 = vand.u32 4294901760, %v2515_v36  ;;  %v2575_v36 = vsub.f32 %v4742_v42, %v5010_v22  ;;  %v2522_v4 = vand.u32 4294901760, %v2521_v9  ;;  %v2540_v20 = vand.u32 4294901760, %v2539_v56 }
 0x65c   : > { %3640 = vmatpush1.bf16.msra.mxu0 %v4584_v57  ;;  %v2545_v11 = vsub.f32 %v4691_v12, %v5011_v13  ;;  %v2563_v26 = vsub.f32 %v4732_v53, %v5012_v29  ;;  %v5055_v2 = vand.u32 4294901760, %v4701_v6  ;;  %v5057_v27 = vand.u32 4294901760, %v4703_v47 }
 0x65d   : > { %3642 = vmatprep.subr.bf16.mxu0 %v4620_v37  ;;  %v2576_v13 = vand.u32 4294901760, %v2575_v36  ;;  %v5046_v36 = vand.u32 4294901760, %v4588_v58 }
 0x65e   : > { %3588 = vmatpush1.bf16.msra.mxu1 %v3587_v24  ;;  %v3593_v24 = vpack.c.bf16 %v2528_v46, %v2516_v63  ;;  %v2581_v46 = vsub.f32 %v4744_v21, %v5013_v17  ;;  %v2558_v63 = vand.u32 4294901760, %v2557_v34  ;;  %v2546_v9 = vand.u32 4294901760, %v2545_v11 }
 0x65f   : > { %3590 = vmatprep.subr.bf16.mxu1 %v4532_v31  ;;  %v2552_v31 = vand.u32 4294901760, %v2551_v48  ;;  %v3595_v48 = vpack.c.bf16 %v2534_v15, %v2522_v4  ;;  %v2564_v56 = vand.u32 4294901760, %v2563_v26  ;;  %v5039_v11 = vand.u32 4294901760, %v4559_v62 }
 0x660   : > { %3644 = vmatpush1.bf16.msra.mxu0 %v4614_v39  ;;  %v2582_v29 = vand.u32 4294901760, %v2581_v46  ;;  %v5043_v34 = vand.u32 4294901760, %v4576_v1  ;;  %v5045_v62 = vand.u32 4294901760, %v4578_v45  ;;  %v5048_v26 = vand.u32 4294901760, %v4616_v40  ;;  %v5051_v46 = vld [vmem:[#allocation16_spill] sm:$0xff] }
 0x661   : > { %3646 = vmatprep.subr.bf16.mxu0 %v4508_v10  ;;  %v3597_v22 = vpack.c.bf16 %v2552_v31, %v2540_v20  ;;  %v3601_v17 = vpack.c.bf16 %v2576_v13, %v2564_v56  ;;  %v5049_v1 = vand.u32 4294901760, %v4606_v30  ;;  %v5050_v45 = vand.u32 4294901760, %v4652_v52  ;;  %v3872_v56 = vld [vmem:[%s4211_s7 + $0x20] sm:$0xff] }
 0x662   : > { %3592 = vmatpush1.bf16.msra.mxu1 %v4534_v32  ;;  %v2569_v32 = vsub.f32 %v4734_v61, %v2568_v5  ;;  %v5038_v61 = vand.u32 4294901760, %v4549_v55  ;;  %v5044_v55 = vand.u32 4294901760, %v4586_v51  ;;  %v5053_v40 = vand.u32 4294901760, %v4654_v50 }
 0x663   : > { %3594 = vmatprep.subr.bf16.mxu1 %v3593_v24  ;;  %v3599_v24 = vpack.c.bf16 %v2558_v63, %v2546_v9  ;;  %v3671_v51 = vpack.c.bf16 %v2484_v25, %v5049_v1  ;;  %v3677_v58 = vpack.c.bf16 %v5050_v45, %v2514_v33  ;;  %v5054_v30 = vand.u32 4294901760, %v4697_v8 }
 0x664   : > { %3648 = vmatpush1.bf16.msra.mxu0 %v4512_v14  ;;  %v2570_v15 = vand.u32 4294901760, %v2569_v32  ;;  %v3661_v4 = vpack.c.bf16 %v5039_v11, %v5038_v61  ;;  %v3665_v31 = vpack.c.bf16 %v5044_v55, %v5043_v34  ;;  %v5058_v33 = vand.u32 4294901760, %v4732_v53  ;;  %v5062_v53 = vld [vmem:[#allocation12_spill] sm:$0xff]  ;;  %v5063_v32 = vld [vmem:[#allocation13_spill] sm:$0xff]  ;;  %v5065_v61 = vld [vmem:[#allocation15_spill] sm:$0xff] }
 0x665   : > { %3650 = vmatprep.subr.bf16.mxu0 %v4660_v41  ;;  %v3681_v25 = vpack.c.bf16 %v5055_v2, %v5054_v30  ;;  %v5059_v63 = vand.u32 4294901760, %v4742_v42  ;;  %v5060_v50 = vand.u32 4294901760, %v4744_v21  ;;  %v3876_v34 = vld [vmem:[%s4211_s7 + $0x38] sm:$0xff] }
 0x666   : > { %3596 = vmatpush1.bf16.msra.mxu1 %v3595_v48  ;;  %v3603_v20 = vpack.c.bf16 %v2582_v29, %v2570_v15  ;;  %v5042_v29 = vand.u32 4294901760, %v4637_v7  ;;  %v3142_v55 = vmul.f32 %v3876_v34, %v5065_v61 }
 0x667   : > { %3598 = vmatprep.subr.bf16.mxu1 %v3597_v22  ;;  %v5040_v22 = vand.u32 4294901760, %v4555_v59  ;;  %v3667_v59 = vpack.c.bf16 %v5046_v36, %v5045_v62  ;;  %v3687_v8 = vpack.c.bf16 %v5060_v50, %v2568_v5  ;;  %v3871_v5 = vld [vmem:[%s4211_s7] sm:$0xff] }
 0x668   : > { %3652 = vmatpush1.bf16.msra.mxu0 %v4650_v35  ;;  %v3135_v9 = vmul.f32 %v3871_v5, %v5063_v32 }
 0x669   : > { %3654 = vmatprep.subr.bf16.mxu0 %v4705_v0 }
 0x66a   : > { %3600 = vmatpush1.bf16.msra.mxu1 %v3599_v24  ;;  %v5064_v24 = vld [vmem:[#allocation14_spill] sm:$0xff] }
 0x66b   : > { %3602 = vmatprep.subr.bf16.mxu1 %v3601_v17  ;;  %v5041_v17 = vand.u32 4294901760, %v4561_v3  ;;  %v5047_v3 = vand.u32 4294901760, %v4612_v38  ;;  %v5052_v38 = vand.u32 4294901760, %v4644_v28  ;;  %v3685_v28 = vpack.c.bf16 %v5059_v63, %v5058_v33 }
 0x66c   : > { %3656 = vmatpush1.bf16.msra.mxu0 %v4699_v54  ;;  %v3139_v15 = vmul.f32 %v3872_v56, %v5064_v24 }
 0x66d   : > { %3658 = vmatprep.subr.bf16.mxu0 %v4746_v19  ;;  %v3663_v13 = vpack.c.bf16 %v5041_v17, %v5040_v22  ;;  %v3669_v7 = vpack.c.bf16 %v5048_v26, %v5047_v3  ;;  %v3679_v48 = vpack.c.bf16 %v5053_v40, %v5052_v38  ;;  %v3874_v22 = vld [vmem:[%s4211_s7 + $0x8] sm:$0xff] }
 0x66e   : > { %3604 = vmatpush1.bf16.msra.mxu1 %v3603_v20  ;;  %v3873_v20 = vld [vmem:[%s4211_s7 + $0x30] sm:$0xff]  ;;  %v3136_v17 = vmul.f32 %v3874_v22, %v5063_v32 }
 0x66f   : > { %v3141_v11 = vmul.f32 %v3873_v20, %v5065_v61 }
 0x670   : > { %3660 = vmatpush1.bf16.msra.mxu0 %v4740_v16 }
 0x671   : > { %3662 = vmatprep.subr.bf16.mxu0 %v3661_v4  ;;  %2622 = vmatmul.mubr.f32.vlgmr.msra.gmra.mrb[8].mxu1 %v4622_v43 }
 0x673   : > { %2853 = vmatmul.mubr.f32.vlgmr.msra.gmra.mrb[2].mxu0 %v5042_v29 }
 0x674   : > { %3664 = vmatpush1.bf16.msra.mxu0 %v3663_v13  ;;  %3007 = vmatprep.mubr.f32.mxu0 %v5037_v49  ;;  %v3875_v13 = vld [vmem:[%s4211_s7 + $0x28] sm:$0xff] }
 0x675   : > { %3666 = vmatprep.subr.bf16.mxu0 %v3665_v31  ;;  %v3140_v29 = vmul.f32 %v3875_v13, %v5064_v24 }
 0x678   : > { %3668 = vmatpush1.bf16.msra.mxu0 %v3667_v59 }
 0x679   : > { %3670 = vmatprep.subr.bf16.mxu0 %v3669_v7 }
 0x67c   : > { %3672 = vmatpush1.bf16.msra.mxu0 %v3671_v51 }
 0x67d   : > { %3674 = vmatprep.subr.bf16.mxu0 %v4526_v23  ;;  %v5056_v23 = vand.u32 4294901760, %v4691_v12 }
 0x67f   : > { %v3683_v52 = vpack.c.bf16 %v5057_v27, %v5056_v23 }
 0x680   : > { %3676 = vmatpush1.bf16.msra.mxu0 %v5051_v46 }
 0x681   : > { %3678 = vmatprep.subr.bf16.mxu0 %v3677_v58 }
 0x684   : > { %3680 = vmatpush1.bf16.msra.mxu0 %v3679_v48 }
 0x685   : > { %3682 = vmatprep.subr.bf16.mxu0 %v3681_v25 }
 0x688   : > { %3684 = vmatpush1.bf16.msra.mxu0 %v3683_v52 }
 0x689   : > { %3686 = vmatprep.subr.bf16.mxu0 %v3685_v28 }
 0x68c   : > { %3688 = vmatpush1.bf16.msra.mxu0 %v3687_v8 }
 0x68d   : > { %3690 = vmatprep.subr.bf16.mxu0 %v4563_v18 }
 0x68f   : > { %3009 = vmatmul.mubr.f32.vlgmr.msra.gmra.mrb[2].mxu0 %v4622_v43 }
 0x690   : > { %3692 = vmatpush1.bf16.msra.mxu0 %v4557_v60  ;;  %3107 = vmatprep.mubr.f32.mxu0 %v5037_v49 }
 0x691   : > { %3694 = vmatprep.subr.bf16.mxu0 %v4590_v44 }
 0x694   : > { %3696 = vmatpush1.bf16.msra.mxu0 %v4584_v57 }
 0x695   : > { %3698 = vmatprep.subr.bf16.mxu0 %v4620_v37 }
 0x698   : > { %3700 = vmatpush1.bf16.msra.mxu0 %v4614_v39 }
 0x699   : > { %3702 = vmatprep.subr.bf16.mxu0 %v4508_v10 }
 0x69c   : > { %3704 = vmatpush1.bf16.msra.mxu0 %v4512_v14 }
 0x69d   : > { %3706 = vmatprep.subr.bf16.mxu0 %v4660_v41 }
 0x6a0   : > { %3708 = vmatpush1.bf16.msra.mxu0 %v4650_v35 }
 0x6a1   : > { %3710 = vmatprep.subr.bf16.mxu0 %v4705_v0 }
 0x6a4   : > { %3712 = vmatpush1.bf16.msra.mxu0 %v4699_v54 }
 0x6a5   : > { %3714 = vmatprep.subr.bf16.mxu0 %v4746_v19  ;;  %v3869_v19 = vld [vmem:[%s4211_s7 + $0x10] sm:$0xff] }
 0x6a6   : > { %v3137_v49 = vmul.f32 %v3869_v19, %v5062_v53 }
 0x6a8   : > { %3716 = vmatpush1.bf16.msra.mxu0 %v4740_v16  ;;  %v3870_v16 = vld [vmem:[%s4211_s7 + $0x18] sm:$0xff]  ;;  %s3168_s7 = scalar_lea.sflag [#allocation5], %s4205_s23 }
 0x6a9   : > { %v3138_v42 = vmul.f32 %v3870_v16, %v5062_v53 }
 0x6ab   : > { %3109 = vmatmul.mubr.f32.vlgmr.msra.gmra.mrb[2].mxu0 %v4622_v43  ;;  %v5061_v43 = vlaneseq }
 0x6ad   : > { %v3144_v12 = vshrl.u32 %v5061_v43, 7 }
 0x6af   : > { %v3145_v54 = vsub.s32 0, %v3144_v12 }
 0x744   : > { %v2623_v60 = vpop.f32.mrb[8].mxu1 }
 0x745   : > { %v2625_v18 = vpop.f32.mrb[9].mxu1 }
 0x77e   : > { %v3110_v57 = vpop.f32.mrb[2].mxu0 }
 0x77f   : > { %v3718_v10 = vadd.f32 %v3110_v57, %v2623_v60  ;;  %v3112_v14 = vpop.f32.mrb[3].mxu0 }
 0x780   : > { %v3719_v44 = vadd.f32 %v3112_v14, %v2625_v18 }
 0x781   : > { %v3282_v39 = vmul.f32 -1.442695, %v3718_v10 }
 0x782   : > { %v3283_v37 = vmul.f32 -1.442695, %v3719_v44 }
 0x783   : > { %3861 = vpow2.f32 %v3282_v39 }
 0x784   : > { %3863 = vpow2.f32 %v3283_v37 }
 0x78d   : > { %v3862_v35 = vpop.eup %3861 }
 0x78e   : > { %v3864_v41 = vpop.eup %3863  ;;  %v3121_v6 = vadd.f32 1.0, %v3862_v35 }
 0x78f   : > { %v3122_v47 = vadd.f32 1.0, %v3864_v41 }
 0x790   : > { %3865 = vrcp.f32 %v3121_v6 }
 0x791   : > { %3867 = vrcp.f32 %v3122_v47 }
 0x79a   : > { %v3866_v0 = vpop.eup %3865 }
 0x79b   : > { %v3868_v21 = vpop.eup %3867  ;;  %v3146_v4 = vrot.slane %v3866_v0, %v3145_v54 }
 0x79c   : > { %v3150_v31 = vrot.slane %v3868_v21, %v3145_v54 }
 0x79d   : > { %v3151_v62 = vmul.f32 %v3146_v4, %v3135_v9  ;;  %v3153_v36 = vmul.f32 %v3146_v4, %v3137_v49  ;;  %v3155_v59 = vmul.f32 %v3146_v4, %v3139_v15  ;;  %v3157_v3 = vmul.f32 %v3146_v4, %v3141_v11 }
 0x79e   : > { %v3152_v26 = vmul.f32 %v3150_v31, %v3136_v17  ;;  %v3154_v7 = vmul.f32 %v3150_v31, %v3138_v42  ;;  %v3156_v1 = vmul.f32 %v3150_v31, %v3140_v29  ;;  %v3158_v51 = vmul.f32 %v3150_v31, %v3142_v55 }
 0x79f   : > { %3159 = vst [vmem:[%s257_s12] sm:$0xff] %v3151_v62  ;;  %3161 = vst [vmem:[%s257_s12 + $0x10] sm:$0xff] %v3153_v36 }
 0x7a0   : > { %3163 = vst [vmem:[%s257_s12 + $0x20] sm:$0xff] %v3155_v59  ;;  %3165 = vst [vmem:[%s257_s12 + $0x30] sm:$0xff] %v3157_v3 }
 0x7a1   : > { %3160 = vst [vmem:[%s257_s12 + $0x8] sm:$0xff] %v3152_v26  ;;  %3162 = vst [vmem:[%s257_s12 + $0x18] sm:$0xff] %v3154_v7 }
 0x7a2   : > { %3164 = vst [vmem:[%s257_s12 + $0x28] sm:$0xff] %v3156_v1  ;;  %3166 = vst [vmem:[%s257_s12 + $0x38] sm:$0xff] %v3158_v51 }
 0x7a3   : > { %3948 = shalt.err (!%p3945_p7)
}
 0x7a4   : > { %s3949_s13 = scalar_lea.hbm %s4932_s11, 1024  ;;  %s3953_s27 = scalar_lea.hbm %s4984_s5, 2048 }
 0x7a5   : > { %p3950_p9 = scmp.ne.s32.totalorder %s4932_s11, %s3949_s13  ;;  %p3954_p5 = scmp.lt.u32.totalorder %s4932_s11, %s4984_s5 }
 0x7a6   : > { %p3955_p11 = scmp.lt.u32.totalorder %s3953_s27, %s3949_s13  ;;  %p3957_p4 = scmp.lt.u32.totalorder %s3949_s13, %s4932_s11 }
 0x7a7   : > { %p3951_p1 = pnand %p3950_p9, %p4154_p12 }
 0x7a8   : > { %p3956_p2 = por %p3955_p11, %p3954_p5 }
 0x7a9   : > { %p3952_p0 = pneg %p3951_p1 }
 0x7aa   : > { %p3958_p6 = por %p3957_p4, %p3956_p2 }
 0x7ac   : > { %p3959_p8 = pnand %p3958_p6, %p3952_p0 }
 0x7ae   : > { %3962 = shalt.err (!%p3959_p8)
}
 0x7af   : > { %s4029_s22 = smov 256  }
 0x7b0   : > { %3772 = dma.vmem_to_hbm [thread:$0]  (%p4154_p12), %s4934_s26, 1024, %s4932_s11, %s3168_s7, %s4029_s22, %s4029_s22, %s4019_s24  }
 0x7b1 PF: > { %s3196_s16 = sand.u32 1, %s3993_s18   ;;  %p5066_p10 = scmp.ne.s32.totalorder %s5015_s25, 0 }
 0x7b2   : > { %p5067_p13 = scmp.ge.s32.totalorder %s4005_s21, 2  ;;  %s3197_s17 = scalar_lea.sflag [#allocation5], %s3196_s16 }
 0x7b4   : > { %p3783_p3 = pnand %p5067_p13, %p5066_p10 }
 0x7b6   : > { %3988 = dma.done.wait (!%p3783_p3), %s3197_s17, 1024  }
 0x7b7   : > { %3990 = vsyncadd (!%p3783_p3), %s3197_s17, 4294966272  ;;  %p19_p7 = scmp.ge.s32.totalorder %s4116_s30, 4   ;;  %s5068_s18 = smov %s3997_s19 }
 0x7b8   : > { %s5069_s19 = smov %s4001_s20  ;;  %s5070_s20 = smov %s4150_s8 }
 0x7b9   : > { %s5071_s21 = smov %s4116_s30  ;;  %21 = sbr.rel (!%p19_p7) target bundleno = 6 (0x6), region = 89 }
 0x7c0   :  { %3202 = vsyncpa [#allocation4], 1 }
 0x7c1   :  { %3204 = vsyncpa [#allocation4 + $0x1], 1 }
 0x7c2   :  { %3205 = vsyncpa [#allocation7], 1 }
 0x7c3   :  { %3206 = vsyncpa [#allocation5], 1 }
 0x7c4   :  { %3208 = vsyncpa [#allocation5 + $0x1], 1 }

</bundles_post_ra>
